<compile_context>
chip_gen: v7x
topology: tpu7x:2x2x1
jax: 0.10.0
libtpu: 0.0.40
codegen_flags: <defaults>
</compile_context>

<pallas_src>
import functools

import jax
import jax.numpy as jnp
from jax.experimental import pallas as pl
from jax.experimental.pallas import tpu as pltpu

EPS = 1e-5
LANE = 128


def _round_up(n, m):
    return (n + m - 1) // m * m


def encoder_kernel(x_ref, w_ref, p_ref, out_ref, *,
                   dims_in, dout_pad, placements, latent, inv_b):
    """Fused 4-layer MLP (Linear->ReLU->BN x3, then Linear).

    x_ref : (B, D_in) bf16 activations.
    w_ref : packed bf16 weight slab; layer i occupies the rectangle
            [r : r+dims_in[i], c : c+dout_pad[i]) with (r, c) = placements[i]
            (r is 16-aligned for bf16 sublanes, c is 128-aligned).
    p_ref : (12, pcols) f32 slab; rows 3i+0/3i+1/3i+2 hold bias/gamma/beta of
            layer i (gamma/beta unused for the last layer).
    """
    h = x_ref[...]                                        # bf16 (B, D_in)
    n = len(dims_in)

    for i in range(n):
        din, dout = dims_in[i], dout_pad[i]
        r, c = placements[i]
        w = w_ref[r:r + din, c:c + dout]                  # bf16 static slice
        b = p_ref[3 * i + 0:3 * i + 1, 0:dout]            # (1, dout) f32
        # bf16 MXU inputs, f32 accumulate.
        z = jnp.dot(h, w, preferred_element_type=jnp.float32) + b

        if i < n - 1:
            a = jnp.maximum(z, 0.0)                       # ReLU (f32, VPU)
            # Training-mode BatchNorm1d, single pass over `a`:
            s1 = jnp.sum(a, axis=0, keepdims=True)
            s2 = jnp.sum(a * a, axis=0, keepdims=True)
            mu = s1 * inv_b
            var = jnp.maximum(s2 * inv_b - mu * mu, 0.0)  # clamp before rsqrt
            g = p_ref[3 * i + 1:3 * i + 2, 0:dout]
            be = p_ref[3 * i + 2:3 * i + 3, 0:dout]
            scale = jax.lax.rsqrt(var + EPS) * g          # (1, dout)
            shift = be - mu * scale
            # Fused scale/shift; cast to bf16 only for the next MXU input.
            h = (a * scale + shift).astype(jnp.bfloat16)
        else:
            # Direct (B, latent) store — no padded slab + wrapper slice.
            out_ref[...] = z[:, :latent].astype(out_ref.dtype)


def encoder_forward(x, packed):
    """x: (B, input_size) bfloat16. packed: output of pack_params()."""
    B = x.shape[0]
    vmem = pl.BlockSpec(memory_space=pltpu.MemorySpace.VMEM)
    return pl.pallas_call(
        functools.partial(encoder_kernel,
                          dims_in=packed["dims_in"],
                          dout_pad=packed["dout_pad"],
                          placements=packed["placements"],
                          latent=packed["latent"],
                          inv_b=1.0 / B),
        out_shape=jax.ShapeDtypeStruct((B, packed["latent"]), jnp.float32),
        in_specs=[vmem, vmem, vmem],
        out_specs=vmem,
    )(x, packed["wpack"], packed["ppack"])


def init_encoder_params(key, input_size, hparams):
    """PyTorch-style Linear init (uniform +-1/sqrt(fan_in)); BN gamma=1, beta=0.
    Weights stored (in_features, out_features)."""
    dims = [input_size, hparams["n_hidden_1"], hparams["n_hidden_2"],
            hparams["n_hidden_3"], hparams["latent_size"]]
    params = {}
    keys = jax.random.split(key, 8)
    for i in range(4):
        fan_in, fan_out = dims[i], dims[i + 1]
        bound = 1.0 / jnp.sqrt(fan_in)
        params[f"w{i + 1}"] = jax.random.uniform(
            keys[2 * i], (fan_in, fan_out), minval=-bound, maxval=bound,
            dtype=jnp.float32)
        params[f"b{i + 1}"] = jax.random.uniform(
            keys[2 * i + 1], (1, fan_out), minval=-bound, maxval=bound,
            dtype=jnp.float32)
        if i < 3:  # BatchNorm follows the first three linears
            params[f"g{i + 1}"] = jnp.ones((1, fan_out), jnp.float32)
            params[f"be{i + 1}"] = jnp.zeros((1, fan_out), jnp.float32)
    return params, dims


def pack_params(params, dims):
    """Pack once at init: one tightly-packed bf16 weight slab + one small f32
    bias/gamma/beta slab, so the kernel launch sees 3 operands (3 DMAs)."""
    latent = dims[-1]
    n = len(dims) - 1
    dims_in = tuple(dims[:-1])
    dout_pad = tuple(_round_up(d, LANE) for d in dims[1:])

    # bf16 sublane tile is 16 rows: keep every layer's row offset 16-aligned.
    assert all(d % 16 == 0 for d in dims_in), "in-dims must be multiples of 16"

    wcols = dout_pad[0]
    if n > 1 and sum(dout_pad[1:]) <= wcols:
        # Tight layout: layer 0 spans the full width at the top; layers 1..n-1
        # sit side-by-side below it (col offsets 128-aligned by construction).
        row_base = dims_in[0]
        placements = [(0, 0)]
        col = 0
        for i in range(1, n):
            placements.append((row_base, col))
            col += dout_pad[i]
        rows_total = row_base + max(dims_in[1:])
    else:
        # Fallback: stack layers vertically at col 0 (old, padded layout).
        wcols = max(dout_pad)
        placements, off = [], 0
        for i in range(n):
            placements.append((off, 0))
            off += dims_in[i]
        rows_total = off

    wpack = jnp.zeros((rows_total, wcols), jnp.bfloat16)
    for i in range(n):
        r, c = placements[i]
        w = params[f"w{i + 1}"].astype(jnp.bfloat16)
        w = jnp.pad(w, ((0, 0), (0, dout_pad[i] - w.shape[1])))
        wpack = wpack.at[r:r + dims_in[i], c:c + dout_pad[i]].set(w)

    pcols = max(dout_pad)
    ppack = jnp.zeros((3 * n, pcols), jnp.float32)
    for i in range(n):
        dreal = params[f"b{i + 1}"].shape[-1]
        ppack = ppack.at[3 * i + 0, :dreal].set(params[f"b{i + 1}"].reshape(-1))
        if i < n - 1:
            ppack = ppack.at[3 * i + 1, :dreal].set(params[f"g{i + 1}"].reshape(-1))
            ppack = ppack.at[3 * i + 2, :dreal].set(params[f"be{i + 1}"].reshape(-1))

    return {"wpack": wpack, "ppack": ppack, "dims_in": dims_in,
            "dout_pad": dout_pad, "placements": tuple(placements),
            "latent": latent}


def reference_forward(x, params):
    """Pure-JAX reference matching the kernel math (bf16 MXU inputs, f32
    accumulate, training-mode BatchNorm1d)."""
    h = x.astype(jnp.bfloat16)
    for i in range(1, 4):
        z = jnp.dot(h, params[f"w{i}"].astype(jnp.bfloat16),
                    preferred_element_type=jnp.float32) + params[f"b{i}"]
        a = jnp.maximum(z, 0.0)
        mu = jnp.mean(a, axis=0, keepdims=True)
        var = jnp.mean((a - mu) ** 2, axis=0, keepdims=True)
        h = ((a - mu) * jax.lax.rsqrt(var + EPS) * params[f"g{i}"]
             + params[f"be{i}"]).astype(jnp.bfloat16)
    return jnp.dot(h, params["w4"].astype(jnp.bfloat16),
                   preferred_element_type=jnp.float32) + params["b4"]


if __name__ == "__main__":
    # Shapes consistent with the module defaults (input 28*28 = 784, hidden
    # 512/256/128, latent 20); modest batch so BN statistics are meaningful
    # while each matmul still feeds whole MXU row tiles.
    hparams = {"n_hidden_1": 512, "n_hidden_2": 256,
               "n_hidden_3": 128, "latent_size": 20}
    input_size = 28 * 28
    batch = 64

    key = jax.random.PRNGKey(0)
    k_x, k_p = jax.random.split(key)
    # Activations are kept bf16 upstream so the x DMA moves half the bytes.
    x = jax.random.normal(k_x, (batch, input_size),
                          dtype=jnp.float32).astype(jnp.bfloat16)
    params, dims = init_encoder_params(k_p, input_size, hparams)
    packed = pack_params(params, dims)

    out = jax.block_until_ready(encoder_forward(x, packed))

    ref = reference_forward(x, params)
    assert out.shape == (batch, hparams["latent_size"])
    max_diff = float(jnp.max(jnp.abs(out - ref)))
    assert jnp.allclose(out, ref, atol=1e-2, rtol=1e-2), (
        f"mismatch vs reference: max abs diff {max_diff}")

    print("KERNEL_OK")
</pallas_src>

<mosaic_0001>
module attributes {stable_mosaic.version = 11 : i64} {
  func.func @encoder_kernel(%arg0: memref<64x784xbf16, #tpu.memory_space<vmem>>, %arg1: memref<1296x512xbf16, #tpu.memory_space<vmem>>, %arg2: memref<12x512xf32, #tpu.memory_space<vmem>>, %arg3: memref<64x20xf32, #tpu.memory_space<vmem>>) attributes {dimension_semantics = [], scalar_prefetch = 0 : i64, scratch_operands = 0 : i64, tpu.core_type = #tpu.core_type<tc>} {
    %c0 = arith.constant 0 : index
    %c0_0 = arith.constant 0 : index
    %0 = vector.load %arg0[%c0, %c0_0] : memref<64x784xbf16, #tpu.memory_space<vmem>>, vector<64x784xbf16>
    %c0_1 = arith.constant 0 : index
    %c0_2 = arith.constant 0 : index
    %1 = vector.load %arg1[%c0_1, %c0_2] : memref<1296x512xbf16, #tpu.memory_space<vmem>>, vector<784x512xbf16>
    %c0_3 = arith.constant 0 : index
    %c0_4 = arith.constant 0 : index
    %2 = vector.load %arg2[%c0_3, %c0_4] : memref<12x512xf32, #tpu.memory_space<vmem>>, vector<1x512xf32>
    %cst = arith.constant dense<0.000000e+00> : vector<64x512xf32>
    %3 = tpu.matmul %0, %1, %cst {dimension_numbers = #tpu.dot_dimension_numbers<[1], [0], [0], [1], [0, 0, 1, 1], [], []>} : vector<64x784xbf16>, vector<784x512xbf16>, vector<64x512xf32> -> vector<64x512xf32>
    %4 = vector.broadcast %2 : vector<1x512xf32> to vector<64x512xf32>
    %5 = arith.addf %3, %4 : vector<64x512xf32>
    %cst_5 = arith.constant 0.000000e+00 : f32
    %6 = vector.broadcast %cst_5 : f32 to vector<64x512xf32>
    %7 = arith.maximumf %5, %6 : vector<64x512xf32>
    %cst_6 = arith.constant dense<0.000000e+00> : vector<512xf32>
    %8 = vector.multi_reduction <add>, %7, %cst_6 [0] : vector<64x512xf32> to vector<512xf32>
    %9 = vector.shape_cast %8 : vector<512xf32> to vector<1x512xf32>
    %10 = arith.mulf %7, %7 : vector<64x512xf32>
    %cst_7 = arith.constant dense<0.000000e+00> : vector<512xf32>
    %11 = vector.multi_reduction <add>, %10, %cst_7 [0] : vector<64x512xf32> to vector<512xf32>
    %12 = vector.shape_cast %11 : vector<512xf32> to vector<1x512xf32>
    %cst_8 = arith.constant 1.562500e-02 : f32
    %13 = vector.broadcast %cst_8 : f32 to vector<1x512xf32>
    %14 = arith.mulf %9, %13 : vector<1x512xf32>
    %cst_9 = arith.constant 1.562500e-02 : f32
    %15 = vector.broadcast %cst_9 : f32 to vector<1x512xf32>
    %16 = arith.mulf %12, %15 : vector<1x512xf32>
    %17 = arith.mulf %14, %14 : vector<1x512xf32>
    %18 = arith.subf %16, %17 : vector<1x512xf32>
    %cst_10 = arith.constant 0.000000e+00 : f32
    %19 = vector.broadcast %cst_10 : f32 to vector<1x512xf32>
    %20 = arith.maximumf %18, %19 : vector<1x512xf32>
    %c1 = arith.constant 1 : index
    %c0_11 = arith.constant 0 : index
    %21 = vector.load %arg2[%c1, %c0_11] : memref<12x512xf32, #tpu.memory_space<vmem>>, vector<1x512xf32>
    %c2 = arith.constant 2 : index
    %c0_12 = arith.constant 0 : index
    %22 = vector.load %arg2[%c2, %c0_12] : memref<12x512xf32, #tpu.memory_space<vmem>>, vector<1x512xf32>
    %cst_13 = arith.constant 9.99999974E-6 : f32
    %23 = vector.broadcast %cst_13 : f32 to vector<1x512xf32>
    %24 = arith.addf %20, %23 : vector<1x512xf32>
    %25 = math.rsqrt %24 : vector<1x512xf32>
    %26 = arith.mulf %25, %21 : vector<1x512xf32>
    %27 = arith.mulf %14, %26 : vector<1x512xf32>
    %28 = arith.subf %22, %27 : vector<1x512xf32>
    %29 = vector.broadcast %26 : vector<1x512xf32> to vector<64x512xf32>
    %30 = arith.mulf %7, %29 : vector<64x512xf32>
    %31 = vector.broadcast %28 : vector<1x512xf32> to vector<64x512xf32>
    %32 = arith.addf %30, %31 : vector<64x512xf32>
    %33 = arith.truncf %32 : vector<64x512xf32> to vector<64x512xbf16>
    %c784 = arith.constant 784 : index
    %c0_14 = arith.constant 0 : index
    %34 = vector.load %arg1[%c784, %c0_14] : memref<1296x512xbf16, #tpu.memory_space<vmem>>, vector<512x256xbf16>
    %c3 = arith.constant 3 : index
    %c0_15 = arith.constant 0 : index
    %35 = vector.load %arg2[%c3, %c0_15] : memref<12x512xf32, #tpu.memory_space<vmem>>, vector<1x256xf32>
    %cst_16 = arith.constant dense<0.000000e+00> : vector<64x256xf32>
    %36 = tpu.matmul %33, %34, %cst_16 {dimension_numbers = #tpu.dot_dimension_numbers<[1], [0], [0], [1], [0, 0, 1, 1], [], []>} : vector<64x512xbf16>, vector<512x256xbf16>, vector<64x256xf32> -> vector<64x256xf32>
    %37 = vector.broadcast %35 : vector<1x256xf32> to vector<64x256xf32>
    %38 = arith.addf %36, %37 : vector<64x256xf32>
    %cst_17 = arith.constant 0.000000e+00 : f32
    %39 = vector.broadcast %cst_17 : f32 to vector<64x256xf32>
    %40 = arith.maximumf %38, %39 : vector<64x256xf32>
    %cst_18 = arith.constant dense<0.000000e+00> : vector<256xf32>
    %41 = vector.multi_reduction <add>, %40, %cst_18 [0] : vector<64x256xf32> to vector<256xf32>
    %42 = vector.shape_cast %41 : vector<256xf32> to vector<1x256xf32>
    %43 = arith.mulf %40, %40 : vector<64x256xf32>
    %cst_19 = arith.constant dense<0.000000e+00> : vector<256xf32>
    %44 = vector.multi_reduction <add>, %43, %cst_19 [0] : vector<64x256xf32> to vector<256xf32>
    %45 = vector.shape_cast %44 : vector<256xf32> to vector<1x256xf32>
    %cst_20 = arith.constant 1.562500e-02 : f32
    %46 = vector.broadcast %cst_20 : f32 to vector<1x256xf32>
    %47 = arith.mulf %42, %46 : vector<1x256xf32>
    %cst_21 = arith.constant 1.562500e-02 : f32
    %48 = vector.broadcast %cst_21 : f32 to vector<1x256xf32>
    %49 = arith.mulf %45, %48 : vector<1x256xf32>
    %50 = arith.mulf %47, %47 : vector<1x256xf32>
    %51 = arith.subf %49, %50 : vector<1x256xf32>
    %cst_22 = arith.constant 0.000000e+00 : f32
    %52 = vector.broadcast %cst_22 : f32 to vector<1x256xf32>
    %53 = arith.maximumf %51, %52 : vector<1x256xf32>
    %c4 = arith.constant 4 : index
    %c0_23 = arith.constant 0 : index
    %54 = vector.load %arg2[%c4, %c0_23] : memref<12x512xf32, #tpu.memory_space<vmem>>, vector<1x256xf32>
    %c5 = arith.constant 5 : index
    %c0_24 = arith.constant 0 : index
    %55 = vector.load %arg2[%c5, %c0_24] : memref<12x512xf32, #tpu.memory_space<vmem>>, vector<1x256xf32>
    %cst_25 = arith.constant 9.99999974E-6 : f32
    %56 = vector.broadcast %cst_25 : f32 to vector<1x256xf32>
    %57 = arith.addf %53, %56 : vector<1x256xf32>
    %58 = math.rsqrt %57 : vector<1x256xf32>
    %59 = arith.mulf %58, %54 : vector<1x256xf32>
    %60 = arith.mulf %47, %59 : vector<1x256xf32>
    %61 = arith.subf %55, %60 : vector<1x256xf32>
    %62 = vector.broadcast %59 : vector<1x256xf32> to vector<64x256xf32>
    %63 = arith.mulf %40, %62 : vector<64x256xf32>
    %64 = vector.broadcast %61 : vector<1x256xf32> to vector<64x256xf32>
    %65 = arith.addf %63, %64 : vector<64x256xf32>
    %66 = arith.truncf %65 : vector<64x256xf32> to vector<64x256xbf16>
    %c784_26 = arith.constant 784 : index
    %c256 = arith.constant 256 : index
    %67 = vector.load %arg1[%c784_26, %c256] : memref<1296x512xbf16, #tpu.memory_space<vmem>>, vector<256x128xbf16>
    %c6 = arith.constant 6 : index
    %c0_27 = arith.constant 0 : index
    %68 = vector.load %arg2[%c6, %c0_27] : memref<12x512xf32, #tpu.memory_space<vmem>>, vector<1x128xf32>
    %cst_28 = arith.constant dense<0.000000e+00> : vector<64x128xf32>
    %69 = tpu.matmul %66, %67, %cst_28 {dimension_numbers = #tpu.dot_dimension_numbers<[1], [0], [0], [1], [0, 0, 1, 1], [], []>} : vector<64x256xbf16>, vector<256x128xbf16>, vector<64x128xf32> -> vector<64x128xf32>
    %70 = vector.broadcast %68 : vector<1x128xf32> to vector<64x128xf32>
    %71 = arith.addf %69, %70 : vector<64x128xf32>
    %cst_29 = arith.constant 0.000000e+00 : f32
    %72 = vector.broadcast %cst_29 : f32 to vector<64x128xf32>
    %73 = arith.maximumf %71, %72 : vector<64x128xf32>
    %cst_30 = arith.constant dense<0.000000e+00> : vector<128xf32>
    %74 = vector.multi_reduction <add>, %73, %cst_30 [0] : vector<64x128xf32> to vector<128xf32>
    %75 = vector.shape_cast %74 : vector<128xf32> to vector<1x128xf32>
    %76 = arith.mulf %73, %73 : vector<64x128xf32>
    %cst_31 = arith.constant dense<0.000000e+00> : vector<128xf32>
    %77 = vector.multi_reduction <add>, %76, %cst_31 [0] : vector<64x128xf32> to vector<128xf32>
    %78 = vector.shape_cast %77 : vector<128xf32> to vector<1x128xf32>
    %cst_32 = arith.constant 1.562500e-02 : f32
    %79 = vector.broadcast %cst_32 : f32 to vector<1x128xf32>
    %80 = arith.mulf %75, %79 : vector<1x128xf32>
    %cst_33 = arith.constant 1.562500e-02 : f32
    %81 = vector.broadcast %cst_33 : f32 to vector<1x128xf32>
    %82 = arith.mulf %78, %81 : vector<1x128xf32>
    %83 = arith.mulf %80, %80 : vector<1x128xf32>
    %84 = arith.subf %82, %83 : vector<1x128xf32>
    %cst_34 = arith.constant 0.000000e+00 : f32
    %85 = vector.broadcast %cst_34 : f32 to vector<1x128xf32>
    %86 = arith.maximumf %84, %85 : vector<1x128xf32>
    %c7 = arith.constant 7 : index
    %c0_35 = arith.constant 0 : index
    %87 = vector.load %arg2[%c7, %c0_35] : memref<12x512xf32, #tpu.memory_space<vmem>>, vector<1x128xf32>
    %c8 = arith.constant 8 : index
    %c0_36 = arith.constant 0 : index
    %88 = vector.load %arg2[%c8, %c0_36] : memref<12x512xf32, #tpu.memory_space<vmem>>, vector<1x128xf32>
    %cst_37 = arith.constant 9.99999974E-6 : f32
    %89 = vector.broadcast %cst_37 : f32 to vector<1x128xf32>
    %90 = arith.addf %86, %89 : vector<1x128xf32>
    %91 = math.rsqrt %90 : vector<1x128xf32>
    %92 = arith.mulf %91, %87 : vector<1x128xf32>
    %93 = arith.mulf %80, %92 : vector<1x128xf32>
    %94 = arith.subf %88, %93 : vector<1x128xf32>
    %95 = vector.broadcast %92 : vector<1x128xf32> to vector<64x128xf32>
    %96 = arith.mulf %73, %95 : vector<64x128xf32>
    %97 = vector.broadcast %94 : vector<1x128xf32> to vector<64x128xf32>
    %98 = arith.addf %96, %97 : vector<64x128xf32>
    %99 = arith.truncf %98 : vector<64x128xf32> to vector<64x128xbf16>
    %c784_38 = arith.constant 784 : index
    %c384 = arith.constant 384 : index
    %100 = vector.load %arg1[%c784_38, %c384] : memref<1296x512xbf16, #tpu.memory_space<vmem>>, vector<128x128xbf16>
    %c9 = arith.constant 9 : index
    %c0_39 = arith.constant 0 : index
    %101 = vector.load %arg2[%c9, %c0_39] : memref<12x512xf32, #tpu.memory_space<vmem>>, vector<1x128xf32>
    %cst_40 = arith.constant dense<0.000000e+00> : vector<64x128xf32>
    %102 = tpu.matmul %99, %100, %cst_40 {dimension_numbers = #tpu.dot_dimension_numbers<[1], [0], [0], [1], [0, 0, 1, 1], [], []>} : vector<64x128xbf16>, vector<128x128xbf16>, vector<64x128xf32> -> vector<64x128xf32>
    %103 = vector.broadcast %101 : vector<1x128xf32> to vector<64x128xf32>
    %104 = arith.addf %102, %103 : vector<64x128xf32>
    %105 = vector.extract_strided_slice %104 {offsets = [0, 0], sizes = [64, 20], strides = [1, 1]} : vector<64x128xf32> to vector<64x20xf32>
    %c0_41 = arith.constant 0 : index
    %c0_42 = arith.constant 0 : index
    %106 = vector.load %arg3[%c0_41, %c0_42] : memref<64x20xf32, #tpu.memory_space<vmem>>, vector<64x20xf32>
    tpu.vector_store %arg3[%c0_41, %c0_42], %105 {strides = array<i32>} : memref<64x20xf32, #tpu.memory_space<vmem>>, vector<64x20xf32>,
    return
  }
}

</mosaic_0001>

<bundles_post_ra>
// kernel: tpu_custom_call.1
= control target key start
LH: loop header
LB: loop body
LE: loop exit
PB: predicated region body
PF: predicated region fallthrough
CT: control target
= control target key end

     0   :  { %8 = vsyncpa [#allocation3], 0  ;;  %s5391_s0 = inlined_call_operand.hbm [shape: bf16[64,784], index: 0, kind: input, shape index: {}]   ;;  %s5392_s1 = inlined_call_operand.hbm [shape: bf16[1296,512], index: 1, kind: input, shape index: {}]   ;;  %s5393_s2 = inlined_call_operand.hbm [shape: f32[12,512], index: 2, kind: input, shape index: {}]   ;;  %s5394_s3 = inlined_call_operand.vmem [shape: f32[64,20], index: 3, kind: output, shape index: {}]  }
   0x1   :  { %9 = vsyncpa [#allocation5], 0  ;;  %s4659_s12 = smov [#allocation4]   ;;  %s4589_s16 = scalar_lea.hbm %s5392_s1, 41472 }
   0x2   :  { %s27_s13 = sshll.u32 %s4659_s12, 4  ;;  %p4590_p0 = scmp.ne.s32.totalorder %s5392_s1, %s4589_s16  ;;  %s28_s13 = int_to_ptr.vmem [resolvable:$true] %s27_s13 }
   0x3   :  { %p4593_p1 = scmp.lt.u32.totalorder %s4589_s16, %s5392_s1 }
   0x5   :  { %p4595_p2 = pnand %p4593_p1, %p4590_p0 }
   0x7   :  { %4598 = shalt.err (!%p4595_p2)
}
   0x8   :  { %s4599_s21 = scalar_lea.vmem %s28_s13, 41472  ;;  %p4604_p4 = scmp.lt.s32.totalorder %s28_s13, %s28_s13 }
   0x9   :  { %p4600_p3 = scmp.ne.s32.totalorder %s28_s13, %s4599_s21  ;;  %p4605_p5 = scmp.lt.s32.totalorder %s4599_s21, %s4599_s21 }
   0xb   :  { %p4606_p6 = por %p4605_p5, %p4604_p4 }
   0xd   :  { %p4607_p7 = pnand %p4606_p6, %p4600_p3 }
   0xf   :  { %4610 = shalt.err (!%p4607_p7)
}
  0x10   :  { %s4660_s22 = smov 256   ;;  %s4661_s23 = smov 16  }
  0x11   :  { %33 = dma.hbm_to_vmem [thread:$0]  %s5392_s1, 41472, %s28_s13, [#allocation5], %s4660_s22, %s4660_s22, %s4661_s23  }
  0x12   :  { %s4662_s26 = smov [#allocation2]   ;;  %s4611_s30 = scalar_lea.hbm %s5391_s0, 3584 }
  0x13   :  { %s15_s27 = sshll.u32 %s4662_s26, 4  ;;  %p4612_p8 = scmp.ne.s32.totalorder %s5391_s0, %s4611_s30  ;;  %s16_s27 = int_to_ptr.vmem [resolvable:$true] %s15_s27 }
  0x14   :  { %p4615_p9 = scmp.lt.u32.totalorder %s4611_s30, %s5391_s0 }
  0x16   :  { %p4617_p10 = pnand %p4615_p9, %p4612_p8 }
  0x18   :  { %4620 = shalt.err (!%p4617_p10)
}
  0x19   :  { %s4621_s8 = scalar_lea.vmem %s16_s27, 3584  ;;  %p4626_p12 = scmp.lt.s32.totalorder %s16_s27, %s16_s27 }
  0x1a   :  { %p4622_p11 = scmp.ne.s32.totalorder %s16_s27, %s4621_s8  ;;  %p4627_p13 = scmp.lt.s32.totalorder %s4621_s8, %s4621_s8 }
  0x1c   :  { %p4628_p0 = por %p4627_p13, %p4626_p12 }
  0x1e   :  { %p4629_p1 = pnand %p4628_p0, %p4622_p11 }
  0x20   :  { %4632 = shalt.err (!%p4629_p1)
}
  0x21   :  { %s4663_s1 = smov 448   ;;  %s4664_s9 = smov 28  }
  0x22   :  { %21 = dma.hbm_to_vmem [thread:$0]  %s5391_s0, 3584, %s16_s27, [#allocation3], %s4663_s1, %s4663_s1, %s4664_s9  }
  0x23   :  { %s4665_s12 = smov [#allocation6]   ;;  %s4633_s16 = scalar_lea.hbm %s5393_s2, 1024 }
  0x24   :  { %s39_s13 = sshll.u32 %s4665_s12, 4  ;;  %p4634_p2 = scmp.ne.s32.totalorder %s5393_s2, %s4633_s16  ;;  %s40_s13 = int_to_ptr.vmem [resolvable:$true] %s39_s13 }
  0x25   :  { %p4637_p3 = scmp.lt.u32.totalorder %s4633_s16, %s5393_s2 }
  0x27   :  { %p4639_p4 = pnand %p4637_p3, %p4634_p2 }
  0x29   :  { %4642 = shalt.err (!%p4639_p4)
}
  0x2a   :  { %s4643_s21 = scalar_lea.vmem %s40_s13, 1024  ;;  %p4648_p6 = scmp.lt.s32.totalorder %s40_s13, %s40_s13 }
  0x2b   :  { %p4644_p5 = scmp.ne.s32.totalorder %s40_s13, %s4643_s21  ;;  %p4649_p7 = scmp.lt.s32.totalorder %s4643_s21, %s4643_s21 }
  0x2d   :  { %p4650_p8 = por %p4649_p7, %p4648_p6 }
  0x2f   :  { %p4651_p9 = pnand %p4650_p8, %p4644_p5 }
  0x31   :  { %4654 = shalt.err (!%p4651_p9)
}
  0x32   :  { %s4666_s0 = smov 512   ;;  %s4667_s22 = smov 32  }
  0x33   :  { %45 = dma.hbm_to_vmem [thread:$0]  %s5393_s2, 1024, %s40_s13, [#allocation5], %s4666_s0, %s4666_s0, %s4667_s22  }
  0x34   :  { %4655 = dma.done.wait [#allocation3], 3584  }
  0x35   :  { %4656 = vsyncadd [#allocation3], 4294963712 }
  0x36   :  { %4657 = dma.done.wait [#allocation5], 42496  }
  0x37   :  { %4658 = vsyncadd [#allocation5], 4294924800  ;;  %v4668_v0 = vmov 0   ;;  %v4117_v1 = vld [vmem:[#allocation4 + $0x4] ss:$16 sps:$4 sm:$0xff]   ;;  %vm1426_vm0 = vcmask 130048  }
  0x38   :  { %1690 = vmatprep.mubr.bf16.mxu1 %v4668_v0  ;;  %v4119_v2 = vld [vmem:[#allocation4 + $0x604] ss:$16 sps:$4 sm:$0xff]   ;;  %1439 = vmatprep.subr.bf16.mxu0 %v4117_v1  ;;  %v4121_v3 = vld [vmem:[#allocation4] ss:$16 sps:$4 sm:$0xff]   ;;  %v4126_v7 = vld [vmem:[#allocation4 + $0x8] ss:$16 sps:$4 sm:$0xff]  }
  0x39   :  { %v4122_v4 = vld [vmem:[#allocation4 + $0x600] ss:$16 sps:$4 sm:$0xff]   ;;  %1658 = vmatprep.subr.bf16.mxu1 %v4119_v2  ;;  %v4123_v5 = vld [vmem:[#allocation4 + $0x24] ss:$16 sps:$4 sm:$0xff]   ;;  %1440 = vmatpush1.bf16.msra.mxu0 %v4121_v3  ;;  %v4128_v8 = vld [vmem:[#allocation4 + $0xc] ss:$16 sps:$4 sm:$0xff]  }
  0x3a   :  { %1659 = vmatpush1.bf16.msra.mxu1 %v4122_v4  ;;  %v4125_v6 = vld [vmem:[#allocation2 + $0x18] ss:$28 sps:$4 sm:$0xff]   ;;  %1441 = vmatprep.subr.bf16.mxu0 %v4123_v5  ;;  %v4129_v9 = vld [vmem:[#allocation4 + $0x20] ss:$16 sps:$4 sm:$0xff]   ;;  %v4134_v12 = vld [vmem:[#allocation4 + $0x2c] ss:$16 sps:$4 sm:$0xff]  }
  0x3b   :  { %1731 = vmatprep.subr.bf16.mxu1 %v4128_v8  ;;  %v4130_v10 = vld [vmem:[#allocation4 + $0x44] ss:$16 sps:$4 sm:$0xff]   ;;  %v4132_v11 = vld [vmem:[#allocation4 + $0x28] ss:$16 sps:$4 sm:$0xff]   ;;  %v4135_v13 = vld [vmem:[#allocation4 + $0x40] ss:$16 sps:$4 sm:$0xff]  }
  0x3c   :  { %v4136_v14 = vld [vmem:[#allocation4 + $0x64] ss:$16 sps:$4 sm:$0xff]   ;;  %v4138_v15 = vld [vmem:[#allocation4 + $0x48] ss:$16 sps:$4 sm:$0xff]   ;;  %v4140_v16 = vld [vmem:[#allocation4 + $0x4c] ss:$16 sps:$4 sm:$0xff]  }
  0x3d   :  { %3774 = vmatmul.mubr.msk.bf16.vlgmr.msra.gmra.mrb[0].mxu1 %vm1426_vm0, %v4125_v6  ;;  %1442 = vmatpush1.bf16.msra.mxu0 %v4129_v9  ;;  %v4141_v17 = vld [vmem:[#allocation4 + $0x60] ss:$16 sps:$4 sm:$0xff]   ;;  %v4142_v18 = vld [vmem:[#allocation4 + $0x84] ss:$16 sps:$4 sm:$0xff]   ;;  %v4146_v19 = vld [vmem:[#allocation4 + $0x6c] ss:$16 sps:$4 sm:$0xff]  }
  0x3e   :  { %1732 = vmatpush1.bf16.msra.mxu1 %v4126_v7  ;;  %1443 = vmatprep.subr.bf16.mxu0 %v4130_v10  ;;  %v4144_v20 = vld [vmem:[#allocation4 + $0x68] ss:$16 sps:$4 sm:$0xff]   ;;  %v4147_v21 = vld [vmem:[#allocation4 + $0x80] ss:$16 sps:$4 sm:$0xff]   ;;  %v4148_v22 = vld [vmem:[#allocation4 + $0xa4] ss:$16 sps:$4 sm:$0xff]  }
  0x3f   :  { %1700 = vmatprep.mubr.bf16.mxu1 %v4668_v0  ;;  %1733 = vmatprep.subr.bf16.mxu1 %v4134_v12  ;;  %v4152_v23 = vld [vmem:[#allocation4 + $0x8c] ss:$16 sps:$4 sm:$0xff]   ;;  %v4150_v24 = vld [vmem:[#allocation4 + $0x88] ss:$16 sps:$4 sm:$0xff]   ;;  %v4153_v25 = vld [vmem:[#allocation4 + $0xa0] ss:$16 sps:$4 sm:$0xff]  }
  0x40   :  { %v4154_v26 = vld [vmem:[#allocation4 + $0xc4] ss:$16 sps:$4 sm:$0xff]   ;;  %v4158_v27 = vld [vmem:[#allocation4 + $0xac] ss:$16 sps:$4 sm:$0xff]   ;;  %v4156_v28 = vld [vmem:[#allocation4 + $0xa8] ss:$16 sps:$4 sm:$0xff]  }
  0x41   :  { %1444 = vmatpush1.bf16.msra.mxu0 %v4135_v13  ;;  %v4159_v29 = vld [vmem:[#allocation4 + $0xc0] ss:$16 sps:$4 sm:$0xff]   ;;  %v4160_v30 = vld [vmem:[#allocation4 + $0xe4] ss:$16 sps:$4 sm:$0xff]   ;;  %v4164_v31 = vld [vmem:[#allocation4 + $0xcc] ss:$16 sps:$4 sm:$0xff]  }
  0x42   :  { %1734 = vmatpush1.bf16.msra.mxu1 %v4132_v11  ;;  %1445 = vmatprep.subr.bf16.mxu0 %v4136_v14  ;;  %v4162_v32 = vld [vmem:[#allocation4 + $0xc8] ss:$16 sps:$4 sm:$0xff]   ;;  %v4165_v33 = vld [vmem:[#allocation4 + $0xe0] ss:$16 sps:$4 sm:$0xff]   ;;  %v4166_v34 = vld [vmem:[#allocation4 + $0x104] ss:$16 sps:$4 sm:$0xff]  }
  0x43   :  { %1735 = vmatprep.subr.bf16.mxu1 %v4140_v16  ;;  %v4170_v35 = vld [vmem:[#allocation4 + $0xec] ss:$16 sps:$4 sm:$0xff]   ;;  %v4168_v36 = vld [vmem:[#allocation4 + $0xe8] ss:$16 sps:$4 sm:$0xff]   ;;  %v4171_v38 = vld [vmem:[#allocation4 + $0x100] ss:$16 sps:$4 sm:$0xff]  }
  0x44   :  { %v4184_v37 = vld [vmem:[#allocation2 + $0x50] ss:$28 sps:$4 sm:$0xff]   ;;  %v4172_v39 = vld [vmem:[#allocation4 + $0x124] ss:$16 sps:$4 sm:$0xff]   ;;  %v4174_v41 = vld [vmem:[#allocation4 + $0x108] ss:$16 sps:$4 sm:$0xff]  }
  0x45   :  { %1446 = vmatpush1.bf16.msra.mxu0 %v4141_v17  ;;  %v4176_v40 = vld [vmem:[#allocation4 + $0x10c] ss:$16 sps:$4 sm:$0xff]   ;;  %3775 = vmatmul.mubr.msk.bf16.gmra.mrb[4].mxu1 %vm1426_vm0, %v4184_v37  ;;  %v4177_v42 = vld [vmem:[#allocation4 + $0x120] ss:$16 sps:$4 sm:$0xff]   ;;  %v4178_v43 = vld [vmem:[#allocation4 + $0x144] ss:$16 sps:$4 sm:$0xff]  }
  0x46   :  { %1736 = vmatpush1.bf16.msra.mxu1 %v4138_v15  ;;  %1447 = vmatprep.subr.bf16.mxu0 %v4142_v18  ;;  %v4182_v44 = vld [vmem:[#allocation4 + $0x12c] ss:$16 sps:$4 sm:$0xff]   ;;  %v4197_v45 = vld [vmem:[#allocation2 + $0x88] ss:$28 sps:$4 sm:$0xff]   ;;  %v4183_v47 = vld [vmem:[#allocation4 + $0x140] ss:$16 sps:$4 sm:$0xff]  }
  0x47   :  { %1737 = vmatprep.subr.bf16.mxu1 %v4146_v19  ;;  %1710 = vmatprep.mubr.bf16.mxu1 %v4668_v0  ;;  %v4180_v46 = vld [vmem:[#allocation4 + $0x128] ss:$16 sps:$4 sm:$0xff]   ;;  %v4185_v48 = vld [vmem:[#allocation4 + $0x164] ss:$16 sps:$4 sm:$0xff]   ;;  %v4189_v49 = vld [vmem:[#allocation4 + $0x14c] ss:$16 sps:$4 sm:$0xff]  }
  0x48   :  { %v4187_v50 = vld [vmem:[#allocation4 + $0x148] ss:$16 sps:$4 sm:$0xff]   ;;  %v4190_v51 = vld [vmem:[#allocation4 + $0x160] ss:$16 sps:$4 sm:$0xff]   ;;  %v4191_v52 = vld [vmem:[#allocation4 + $0x184] ss:$16 sps:$4 sm:$0xff]  }
  0x49   :  { %1448 = vmatpush1.bf16.msra.mxu0 %v4147_v21  ;;  %v4195_v53 = vld [vmem:[#allocation4 + $0x16c] ss:$16 sps:$4 sm:$0xff]   ;;  %v4193_v54 = vld [vmem:[#allocation4 + $0x168] ss:$16 sps:$4 sm:$0xff]   ;;  %v4196_v56 = vld [vmem:[#allocation4 + $0x180] ss:$16 sps:$4 sm:$0xff]  }
  0x4a   :  { %1738 = vmatpush1.bf16.msra.mxu1 %v4144_v20  ;;  %1449 = vmatprep.subr.bf16.mxu0 %v4148_v22  ;;  %v4210_v55 = vld [vmem:[#allocation2 + $0xc0] ss:$28 sps:$4 sm:$0xff]   ;;  %v4198_v58 = vld [vmem:[#allocation4 + $0x1a4] ss:$16 sps:$4 sm:$0xff]   ;;  %v4200_v60 = vld [vmem:[#allocation4 + $0x188] ss:$16 sps:$4 sm:$0xff]  }
  0x4b   :  { %1739 = vmatprep.subr.bf16.mxu1 %v4152_v23  ;;  %v4219_v57 = vld [vmem:[#allocation2 + $0x4] ss:$28 sps:$4 sm:$0xff]   ;;  %v4202_v59 = vld [vmem:[#allocation4 + $0x18c] ss:$16 sps:$4 sm:$0xff]   ;;  %v4206_v1 = vld [vmem:[#allocation4 + $0x1a8] ss:$16 sps:$4 sm:$0xff]  }
  0x4c   :  { %1471 = vmatprep.mubr.bf16.mxu0 %v4219_v57  ;;  %v4203_v61 = vld [vmem:[#allocation4 + $0x1a0] ss:$16 sps:$4 sm:$0xff]   ;;  %v4204_v62 = vld [vmem:[#allocation4 + $0x1c4] ss:$16 sps:$4 sm:$0xff]   ;;  %v4208_v63 = vld [vmem:[#allocation4 + $0x1ac] ss:$16 sps:$4 sm:$0xff]  }
  0x4d   :  { %1450 = vmatpush1.bf16.msra.mxu0 %v4153_v25  ;;  %3776 = vmatmul.mubr.msk.bf16.gmra.mrb[8].mxu1 %vm1426_vm0, %v4197_v45  ;;  %v4209_v2 = vld [vmem:[#allocation4 + $0x1c0] ss:$16 sps:$4 sm:$0xff]   ;;  %v4211_v3 = vld [vmem:[#allocation4 + $0x1e4] ss:$16 sps:$4 sm:$0xff]   ;;  %v4215_v4 = vld [vmem:[#allocation4 + $0x1cc] ss:$16 sps:$4 sm:$0xff]  }
  0x4e   :  { %1740 = vmatpush1.bf16.msra.mxu1 %v4150_v24  ;;  %1451 = vmatprep.subr.bf16.mxu0 %v4154_v26  ;;  %v4213_v5 = vld [vmem:[#allocation4 + $0x1c8] ss:$16 sps:$4 sm:$0xff]   ;;  %v4216_v6 = vld [vmem:[#allocation4 + $0x1e0] ss:$16 sps:$4 sm:$0xff]   ;;  %v4222_v7 = vld [vmem:[#allocation4 + $0x204] ss:$16 sps:$4 sm:$0xff]  }
  0x4f   :  { %1741 = vmatprep.subr.bf16.mxu1 %v4158_v27  ;;  %1720 = vmatprep.mubr.bf16.mxu1 %v4668_v0  ;;  %v4225_v8 = vld [vmem:[#allocation4 + $0x1ec] ss:$16 sps:$4 sm:$0xff]   ;;  %v4220_v10 = vld [vmem:[#allocation4 + $0x200] ss:$16 sps:$4 sm:$0xff]   ;;  %v4223_v11 = vld [vmem:[#allocation4 + $0x1e8] ss:$16 sps:$4 sm:$0xff]  }
  0x50   :  { %v4217_v9 = vld [vmem:[#allocation2] ss:$28 sps:$4 sm:$0xff]   ;;  %v4228_v12 = vld [vmem:[#allocation4 + $0x224] ss:$16 sps:$4 sm:$0xff]   ;;  %v4229_v15 = vld [vmem:[#allocation4 + $0x208] ss:$16 sps:$4 sm:$0xff]  }
  0x51   :  { %1452 = vmatpush1.bf16.msra.mxu0 %v4159_v29  ;;  %v4231_v13 = vld [vmem:[#allocation4 + $0x20c] ss:$16 sps:$4 sm:$0xff]   ;;  %v4226_v14 = vld [vmem:[#allocation4 + $0x220] ss:$16 sps:$4 sm:$0xff]   ;;  %v4234_v16 = vld [vmem:[#allocation4 + $0x244] ss:$16 sps:$4 sm:$0xff]  }
  0x52   :  { %1742 = vmatpush1.bf16.msra.mxu1 %v4156_v28  ;;  %1453 = vmatprep.subr.bf16.mxu0 %v4160_v30  ;;  %v4237_v17 = vld [vmem:[#allocation4 + $0x22c] ss:$16 sps:$4 sm:$0xff]   ;;  %v4232_v18 = vld [vmem:[#allocation4 + $0x240] ss:$16 sps:$4 sm:$0xff]   ;;  %v4235_v19 = vld [vmem:[#allocation4 + $0x228] ss:$16 sps:$4 sm:$0xff]  }
  0x53   :  { %1743 = vmatprep.subr.bf16.mxu1 %v4164_v31  ;;  %v4240_v20 = vld [vmem:[#allocation4 + $0x264] ss:$16 sps:$4 sm:$0xff]   ;;  %v4243_v21 = vld [vmem:[#allocation4 + $0x24c] ss:$16 sps:$4 sm:$0xff]   ;;  %v4238_v22 = vld [vmem:[#allocation4 + $0x260] ss:$16 sps:$4 sm:$0xff]  }
  0x54   :  { %v4280_v23 = vld [vmem:[#allocation2 + $0x3c] ss:$28 sps:$4 sm:$0xff]   ;;  %v4246_v25 = vld [vmem:[#allocation4 + $0x284] ss:$16 sps:$4 sm:$0xff]   ;;  %v4244_v28 = vld [vmem:[#allocation4 + $0x280] ss:$16 sps:$4 sm:$0xff]  }
  0x55   :  { %1454 = vmatpush1.bf16.msra.mxu0 %v4165_v33  ;;  %3777 = vmatmul.mubr.msk.bf16.gmra.mrb[12].mxu1 %vm1426_vm0, %v4210_v55  ;;  %v4241_v24 = vld [vmem:[#allocation4 + $0x248] ss:$16 sps:$4 sm:$0xff]   ;;  %v4249_v26 = vld [vmem:[#allocation4 + $0x26c] ss:$16 sps:$4 sm:$0xff]   ;;  %v4252_v30 = vld [vmem:[#allocation4 + $0x2a4] ss:$16 sps:$4 sm:$0xff]  }
  0x56   :  { %1744 = vmatpush1.bf16.msra.mxu1 %v4162_v32  ;;  %1455 = vmatprep.subr.bf16.mxu0 %v4166_v34  ;;  %v4288_v27 = vld [vmem:[#allocation2 + $0x38] ss:$28 sps:$4 sm:$0xff]   ;;  %v4255_v31 = vld [vmem:[#allocation4 + $0x28c] ss:$16 sps:$4 sm:$0xff]   ;;  %v4250_v33 = vld [vmem:[#allocation4 + $0x2a0] ss:$16 sps:$4 sm:$0xff]  }
  0x57   :  { %1745 = vmatprep.subr.bf16.mxu1 %v4170_v35  ;;  %1763 = vmatprep.mubr.bf16.mxu1 %v4219_v57  ;;  %v4247_v29 = vld [vmem:[#allocation4 + $0x268] ss:$16 sps:$4 sm:$0xff]   ;;  %v4295_v32 = vld [vmem:[#allocation2 + $0x74] ss:$28 sps:$4 sm:$0xff]   ;;  %vm3535_vm1 = vcmask 162816  }
  0x58   :  { %v4253_v34 = vld [vmem:[#allocation4 + $0x288] ss:$16 sps:$4 sm:$0xff]   ;;  %v4258_v35 = vld [vmem:[#allocation4 + $0x2c4] ss:$16 sps:$4 sm:$0xff]   ;;  %v4256_v37 = vld [vmem:[#allocation4 + $0x2c0] ss:$16 sps:$4 sm:$0xff]  }
  0x59   :  { %1456 = vmatpush1.bf16.msra.mxu0 %v4171_v38  ;;  %v4303_v38 = vld [vmem:[#allocation2 + $0x70] ss:$28 sps:$4 sm:$0xff]   ;;  %v4270_v45 = vld [vmem:[#allocation4 + $0x304] ss:$16 sps:$4 sm:$0xff]  }
  0x5a   :  { %1746 = vmatpush1.bf16.msra.mxu1 %v4168_v36  ;;  %1457 = vmatprep.subr.bf16.mxu0 %v4172_v39  ;;  %v4261_v36 = vld [vmem:[#allocation4 + $0x2ac] ss:$16 sps:$4 sm:$0xff]   ;;  %v4259_v39 = vld [vmem:[#allocation4 + $0x2a8] ss:$16 sps:$4 sm:$0xff]   ;;  %v4284_v55 = vld [vmem:[#allocation4 + $0x344] ss:$16 sps:$4 sm:$0xff]  }
  0x5b   :  { %1747 = vmatprep.subr.bf16.mxu1 %v4176_v40  ;;  %v4264_v40 = vld [vmem:[#allocation4 + $0x2e4] ss:$16 sps:$4 sm:$0xff]   ;;  %v4282_v57 = vld [vmem:[#allocation4 + $0x340] ss:$16 sps:$4 sm:$0xff]  }
  0x5d   :  { %1458 = vmatpush1.bf16.msra.mxu0 %v4177_v42  ;;  %v4267_v42 = vld [vmem:[#allocation4 + $0x2cc] ss:$16 sps:$4 sm:$0xff]  }
  0x5e   :  { %1748 = vmatpush1.bf16.msra.mxu1 %v4174_v41  ;;  %1459 = vmatprep.subr.bf16.mxu0 %v4178_v43  ;;  %v4310_v41 = vld [vmem:[#allocation2 + $0xac] ss:$28 sps:$4 sm:$0xff]   ;;  %v4262_v43 = vld [vmem:[#allocation4 + $0x2e0] ss:$16 sps:$4 sm:$0xff]  }
  0x5f   :  { %1749 = vmatprep.subr.bf16.mxu1 %v4182_v44  ;;  %v4265_v44 = vld [vmem:[#allocation4 + $0x2c8] ss:$16 sps:$4 sm:$0xff]  }
  0x61   :  { %1460 = vmatpush1.bf16.msra.mxu0 %v4183_v47  ;;  %v4268_v47 = vld [vmem:[#allocation4 + $0x300] ss:$16 sps:$4 sm:$0xff]  }
  0x62   :  { %1750 = vmatpush1.bf16.msra.mxu1 %v4180_v46  ;;  %1461 = vmatprep.subr.bf16.mxu0 %v4185_v48  ;;  %v4273_v46 = vld [vmem:[#allocation4 + $0x2ec] ss:$16 sps:$4 sm:$0xff]   ;;  %v4318_v48 = vld [vmem:[#allocation2 + $0xa8] ss:$28 sps:$4 sm:$0xff]  }
  0x63   :  { %1751 = vmatprep.subr.bf16.mxu1 %v4189_v49  ;;  %v4271_v49 = vld [vmem:[#allocation4 + $0x2e8] ss:$16 sps:$4 sm:$0xff]  }
  0x65   :  { %1462 = vmatpush1.bf16.msra.mxu0 %v4190_v51  ;;  %v4276_v51 = vld [vmem:[#allocation4 + $0x324] ss:$16 sps:$4 sm:$0xff]  }
  0x66   :  { %1752 = vmatpush1.bf16.msra.mxu1 %v4187_v50  ;;  %1463 = vmatprep.subr.bf16.mxu0 %v4191_v52  ;;  %v4327_v50 = vld [vmem:[#allocation2 + $0xc] ss:$28 sps:$4 sm:$0xff]  }
  0x67   :  { %1753 = vmatprep.subr.bf16.mxu1 %v4195_v53  ;;  %v4279_v52 = vld [vmem:[#allocation4 + $0x30c] ss:$16 sps:$4 sm:$0xff]   ;;  %v4274_v53 = vld [vmem:[#allocation4 + $0x320] ss:$16 sps:$4 sm:$0xff]  }
  0x69   :  { %1464 = vmatpush1.bf16.msra.mxu0 %v4196_v56  ;;  %v4287_v56 = vld [vmem:[#allocation4 + $0x32c] ss:$16 sps:$4 sm:$0xff]  }
  0x6a   :  { %1754 = vmatpush1.bf16.msra.mxu1 %v4193_v54  ;;  %1465 = vmatprep.subr.bf16.mxu0 %v4198_v58  ;;  %v4277_v54 = vld [vmem:[#allocation4 + $0x308] ss:$16 sps:$4 sm:$0xff]  }
  0x6b   :  { %1755 = vmatprep.subr.bf16.mxu1 %v4202_v59  ;;  %v4285_v58 = vld [vmem:[#allocation4 + $0x328] ss:$16 sps:$4 sm:$0xff]   ;;  %v4291_v59 = vld [vmem:[#allocation4 + $0x364] ss:$16 sps:$4 sm:$0xff]  }
  0x6d   :  { %1466 = vmatpush1.bf16.msra.mxu0 %v4203_v61  ;;  %v4289_v61 = vld [vmem:[#allocation4 + $0x360] ss:$16 sps:$4 sm:$0xff]  }
  0x6e   :  { %1756 = vmatpush1.bf16.msra.mxu1 %v4200_v60  ;;  %1467 = vmatprep.subr.bf16.mxu0 %v4204_v62  ;;  %v4294_v60 = vld [vmem:[#allocation4 + $0x34c] ss:$16 sps:$4 sm:$0xff]   ;;  %v4292_v62 = vld [vmem:[#allocation4 + $0x348] ss:$16 sps:$4 sm:$0xff]  }
  0x6f   :  { %1757 = vmatprep.subr.bf16.mxu1 %v4208_v63  ;;  %v4299_v63 = vld [vmem:[#allocation4 + $0x384] ss:$16 sps:$4 sm:$0xff]  }
  0x71   :  { %1468 = vmatpush1.bf16.msra.mxu0 %v4209_v2  ;;  %v4297_v2 = vld [vmem:[#allocation4 + $0x380] ss:$16 sps:$4 sm:$0xff]  }
  0x72   :  { %1758 = vmatpush1.bf16.msra.mxu1 %v4206_v1  ;;  %1469 = vmatprep.subr.bf16.mxu0 %v4211_v3  ;;  %v4302_v1 = vld [vmem:[#allocation4 + $0x36c] ss:$16 sps:$4 sm:$0xff]   ;;  %v4300_v3 = vld [vmem:[#allocation4 + $0x368] ss:$16 sps:$4 sm:$0xff]  }
  0x73   :  { %1759 = vmatprep.subr.bf16.mxu1 %v4215_v4  ;;  %v4306_v4 = vld [vmem:[#allocation4 + $0x3a4] ss:$16 sps:$4 sm:$0xff]  }
  0x75   :  { %1470 = vmatpush1.bf16.msra.mxu0 %v4216_v6  ;;  %v4304_v6 = vld [vmem:[#allocation4 + $0x3a0] ss:$16 sps:$4 sm:$0xff]  }
  0x76   :  { %1760 = vmatpush1.bf16.msra.mxu1 %v4213_v5  ;;  %1512 = vmatprep.subr.bf16.mxu0 %v4222_v7  ;;  %v4309_v5 = vld [vmem:[#allocation4 + $0x38c] ss:$16 sps:$4 sm:$0xff]   ;;  %v4307_v7 = vld [vmem:[#allocation4 + $0x388] ss:$16 sps:$4 sm:$0xff]  }
  0x77   :  { %1761 = vmatprep.subr.bf16.mxu1 %v4225_v8  ;;  %v4314_v8 = vld [vmem:[#allocation4 + $0x3c4] ss:$16 sps:$4 sm:$0xff]  }
  0x78   :  { %1472 = vmatmul.mubr.bf16.vlgmr.msra.gmra.mrb[0].mxu0 %v4217_v9 }
  0x79   :  { %1513 = vmatpush1.bf16.msra.mxu0 %v4220_v10  ;;  %1481 = vmatprep.mubr.bf16.mxu0 %v4280_v23  ;;  %v4312_v10 = vld [vmem:[#allocation4 + $0x3c0] ss:$16 sps:$4 sm:$0xff]  }
  0x7a   :  { %1762 = vmatpush1.bf16.msra.mxu1 %v4223_v11  ;;  %1514 = vmatprep.subr.bf16.mxu0 %v4228_v12  ;;  %v4315_v11 = vld [vmem:[#allocation4 + $0x3a8] ss:$16 sps:$4 sm:$0xff]   ;;  %v4321_v12 = vld [vmem:[#allocation4 + $0x3e4] ss:$16 sps:$4 sm:$0xff]  }
  0x7b   :  { %1804 = vmatprep.subr.bf16.mxu1 %v4231_v13  ;;  %v4324_v13 = vld [vmem:[#allocation4 + $0x3cc] ss:$16 sps:$4 sm:$0xff]  }
  0x7d   :  { %1764 = vmatmul.mubr.bf16.vlgmr.msra.gmra.mrb[16].mxu1 %v4217_v9  ;;  %1515 = vmatpush1.bf16.msra.mxu0 %v4226_v14  ;;  %v4317_v9 = vld [vmem:[#allocation4 + $0x3ac] ss:$16 sps:$4 sm:$0xff]   ;;  %v4319_v14 = vld [vmem:[#allocation4 + $0x3e0] ss:$16 sps:$4 sm:$0xff]  }
  0x7e   :  { %1805 = vmatpush1.bf16.msra.mxu1 %v4229_v15  ;;  %1516 = vmatprep.subr.bf16.mxu0 %v4234_v16  ;;  %v4322_v15 = vld [vmem:[#allocation4 + $0x3c8] ss:$16 sps:$4 sm:$0xff]   ;;  %v4330_v16 = vld [vmem:[#allocation4 + $0x404] ss:$16 sps:$4 sm:$0xff]  }
  0x7f   :  { %1806 = vmatprep.subr.bf16.mxu1 %v4237_v17  ;;  %1773 = vmatprep.mubr.bf16.mxu1 %v4280_v23  ;;  %v4333_v17 = vld [vmem:[#allocation4 + $0x3ec] ss:$16 sps:$4 sm:$0xff]   ;;  %v4388_v23 = vld [vmem:[#allocation2 + $0x44] ss:$28 sps:$4 sm:$0xff]  }
  0x80   :  { %1482 = vmatmul.mubr.bf16.gmra.mrb[4].mxu0 %v4288_v27 }
  0x81   :  { %1517 = vmatpush1.bf16.msra.mxu0 %v4232_v18  ;;  %1491 = vmatprep.mubr.bf16.mxu0 %v4295_v32  ;;  %v4325_v18 = vld [vmem:[#allocation2 + $0x8] ss:$28 sps:$4 sm:$0xff]  }
  0x82   :  { %1807 = vmatpush1.bf16.msra.mxu1 %v4235_v19  ;;  %1518 = vmatprep.subr.bf16.mxu0 %v4240_v20  ;;  %v4328_v19 = vld [vmem:[#allocation4 + $0x400] ss:$16 sps:$4 sm:$0xff]   ;;  %v4331_v20 = vld [vmem:[#allocation4 + $0x3e8] ss:$16 sps:$4 sm:$0xff]  }
  0x83   :  { %1808 = vmatprep.subr.bf16.mxu1 %v4243_v21  ;;  %v4336_v21 = vld [vmem:[#allocation4 + $0x424] ss:$16 sps:$4 sm:$0xff]  }
  0x85   :  { %1519 = vmatpush1.bf16.msra.mxu0 %v4238_v22  ;;  %1774 = vmatmul.mubr.bf16.gmra.mrb[20].mxu1 %v4288_v27  ;;  %v4339_v22 = vld [vmem:[#allocation4 + $0x40c] ss:$16 sps:$4 sm:$0xff]  }
  0x86   :  { %1809 = vmatpush1.bf16.msra.mxu1 %v4241_v24  ;;  %1520 = vmatprep.subr.bf16.mxu0 %v4246_v25  ;;  %v4334_v24 = vld [vmem:[#allocation4 + $0x420] ss:$16 sps:$4 sm:$0xff]   ;;  %v4337_v25 = vld [vmem:[#allocation4 + $0x408] ss:$16 sps:$4 sm:$0xff]   ;;  %v4345_v27 = vld [vmem:[#allocation4 + $0x42c] ss:$16 sps:$4 sm:$0xff]  }
  0x87   :  { %1810 = vmatprep.subr.bf16.mxu1 %v4249_v26  ;;  %1783 = vmatprep.mubr.bf16.mxu1 %v4295_v32  ;;  %v4342_v26 = vld [vmem:[#allocation4 + $0x444] ss:$16 sps:$4 sm:$0xff]   ;;  %v4351_v32 = vld [vmem:[#allocation4 + $0x44c] ss:$16 sps:$4 sm:$0xff]  }
  0x88   :  { %1492 = vmatmul.mubr.bf16.gmra.mrb[8].mxu0 %v4303_v38 }
  0x89   :  { %1521 = vmatpush1.bf16.msra.mxu0 %v4244_v28  ;;  %1501 = vmatprep.mubr.bf16.mxu0 %v4310_v41  ;;  %v4340_v28 = vld [vmem:[#allocation4 + $0x440] ss:$16 sps:$4 sm:$0xff]  }
  0x8a   :  { %1811 = vmatpush1.bf16.msra.mxu1 %v4247_v29  ;;  %1522 = vmatprep.subr.bf16.mxu0 %v4252_v30  ;;  %v4343_v29 = vld [vmem:[#allocation4 + $0x428] ss:$16 sps:$4 sm:$0xff]   ;;  %v4390_v30 = vld [vmem:[#allocation2 + $0x40] ss:$28 sps:$4 sm:$0xff]  }
  0x8b   :  { %1812 = vmatprep.subr.bf16.mxu1 %v4255_v31  ;;  %v4348_v31 = vld [vmem:[#allocation4 + $0x464] ss:$16 sps:$4 sm:$0xff]  }
  0x8d   :  { %1523 = vmatpush1.bf16.msra.mxu0 %v4250_v33  ;;  %1784 = vmatmul.mubr.bf16.gmra.mrb[24].mxu1 %v4303_v38  ;;  %v4403_v33 = vld [vmem:[#allocation2 + $0x7c] ss:$28 sps:$4 sm:$0xff]   ;;  %v4352_v38 = vld [vmem:[#allocation4 + $0x480] ss:$16 sps:$4 sm:$0xff]  }
  0x8e   :  { %1813 = vmatpush1.bf16.msra.mxu1 %v4253_v34  ;;  %1524 = vmatprep.subr.bf16.mxu0 %v4258_v35  ;;  %v4346_v34 = vld [vmem:[#allocation4 + $0x460] ss:$16 sps:$4 sm:$0xff]   ;;  %v4349_v35 = vld [vmem:[#allocation4 + $0x448] ss:$16 sps:$4 sm:$0xff]  }
  0x8f   :  { %1814 = vmatprep.subr.bf16.mxu1 %v4261_v36  ;;  %1793 = vmatprep.mubr.bf16.mxu1 %v4310_v41  ;;  %v4354_v36 = vld [vmem:[#allocation4 + $0x484] ss:$16 sps:$4 sm:$0xff]  }
  0x90   :  { %1502 = vmatmul.mubr.bf16.gmra.mrb[12].mxu0 %v4318_v48  ;;  %v4360_v41 = vld [vmem:[#allocation4 + $0x4a4] ss:$16 sps:$4 sm:$0xff]  }
  0x91   :  { %1525 = vmatpush1.bf16.msra.mxu0 %v4256_v37  ;;  %1544 = vmatprep.mubr.bf16.mxu0 %v4327_v50  ;;  %v4357_v37 = vld [vmem:[#allocation4 + $0x46c] ss:$16 sps:$4 sm:$0xff]  }
  0x92   :  { %1815 = vmatpush1.bf16.msra.mxu1 %v4259_v39  ;;  %1526 = vmatprep.subr.bf16.mxu0 %v4264_v40  ;;  %v4355_v39 = vld [vmem:[#allocation4 + $0x468] ss:$16 sps:$4 sm:$0xff]  }
  0x93   :  { %1816 = vmatprep.subr.bf16.mxu1 %v4267_v42  ;;  %v4405_v40 = vld [vmem:[#allocation2 + $0x78] ss:$28 sps:$4 sm:$0xff]   ;;  %v4363_v42 = vld [vmem:[#allocation4 + $0x48c] ss:$16 sps:$4 sm:$0xff]  }
  0x95   :  { %1527 = vmatpush1.bf16.msra.mxu0 %v4262_v43  ;;  %1794 = vmatmul.mubr.bf16.gmra.mrb[28].mxu1 %v4318_v48  ;;  %v4418_v43 = vld [vmem:[#allocation2 + $0xb4] ss:$28 sps:$4 sm:$0xff]  }
  0x96   :  { %1817 = vmatpush1.bf16.msra.mxu1 %v4265_v44  ;;  %1528 = vmatprep.subr.bf16.mxu0 %v4270_v45  ;;  %v4358_v44 = vld [vmem:[#allocation4 + $0x4a0] ss:$16 sps:$4 sm:$0xff]   ;;  %v4361_v45 = vld [vmem:[#allocation4 + $0x488] ss:$16 sps:$4 sm:$0xff]  }
  0x97   :  { %1818 = vmatprep.subr.bf16.mxu1 %v4273_v46  ;;  %1836 = vmatprep.mubr.bf16.mxu1 %v4327_v50  ;;  %v4366_v46 = vld [vmem:[#allocation4 + $0x4c4] ss:$16 sps:$4 sm:$0xff]   ;;  %v4364_v48 = vld [vmem:[#allocation4 + $0x4c0] ss:$16 sps:$4 sm:$0xff]  }
  0x98   :  { %v4372_v50 = vld [vmem:[#allocation4 + $0x4e4] ss:$16 sps:$4 sm:$0xff]  }
  0x99   :  { %1529 = vmatpush1.bf16.msra.mxu0 %v4268_v47  ;;  %v4369_v47 = vld [vmem:[#allocation4 + $0x4ac] ss:$16 sps:$4 sm:$0xff]  }
  0x9a   :  { %1819 = vmatpush1.bf16.msra.mxu1 %v4271_v49  ;;  %1530 = vmatprep.subr.bf16.mxu0 %v4276_v51  ;;  %v4367_v49 = vld [vmem:[#allocation4 + $0x4a8] ss:$16 sps:$4 sm:$0xff]   ;;  %v4375_v51 = vld [vmem:[#allocation4 + $0x4cc] ss:$16 sps:$4 sm:$0xff]  }
  0x9b   :  { %1820 = vmatprep.subr.bf16.mxu1 %v4279_v52  ;;  %v4420_v52 = vld [vmem:[#allocation2 + $0xb0] ss:$28 sps:$4 sm:$0xff]  }
  0x9d   :  { %1531 = vmatpush1.bf16.msra.mxu0 %v4274_v53  ;;  %v4435_v53 = vld [vmem:[#allocation2 + $0x14] ss:$28 sps:$4 sm:$0xff]  }
  0x9e   :  { %1821 = vmatpush1.bf16.msra.mxu1 %v4277_v54  ;;  %1532 = vmatprep.subr.bf16.mxu0 %v4284_v55  ;;  %v4370_v54 = vld [vmem:[#allocation4 + $0x4e0] ss:$16 sps:$4 sm:$0xff]   ;;  %v4373_v55 = vld [vmem:[#allocation4 + $0x4c8] ss:$16 sps:$4 sm:$0xff]  }
  0x9f   :  { %1822 = vmatprep.subr.bf16.mxu1 %v4287_v56  ;;  %v4378_v56 = vld [vmem:[#allocation4 + $0x504] ss:$16 sps:$4 sm:$0xff]  }
  0xa1   :  { %1533 = vmatpush1.bf16.msra.mxu0 %v4282_v57  ;;  %v4381_v57 = vld [vmem:[#allocation4 + $0x4ec] ss:$16 sps:$4 sm:$0xff]  }
  0xa2   :  { %1823 = vmatpush1.bf16.msra.mxu1 %v4285_v58  ;;  %1534 = vmatprep.subr.bf16.mxu0 %v4291_v59  ;;  %v4376_v58 = vld [vmem:[#allocation4 + $0x500] ss:$16 sps:$4 sm:$0xff]   ;;  %v4379_v59 = vld [vmem:[#allocation4 + $0x4e8] ss:$16 sps:$4 sm:$0xff]  }
  0xa3   :  { %1824 = vmatprep.subr.bf16.mxu1 %v4294_v60  ;;  %v4384_v60 = vld [vmem:[#allocation4 + $0x524] ss:$16 sps:$4 sm:$0xff]  }
  0xa5   :  { %1535 = vmatpush1.bf16.msra.mxu0 %v4289_v61  ;;  %v4387_v61 = vld [vmem:[#allocation4 + $0x50c] ss:$16 sps:$4 sm:$0xff]  }
  0xa6   :  { %1825 = vmatpush1.bf16.msra.mxu1 %v4292_v62  ;;  %1536 = vmatprep.subr.bf16.mxu0 %v4299_v63  ;;  %v4382_v62 = vld [vmem:[#allocation4 + $0x520] ss:$16 sps:$4 sm:$0xff]   ;;  %v4385_v63 = vld [vmem:[#allocation4 + $0x508] ss:$16 sps:$4 sm:$0xff]  }
  0xa7   :  { %1826 = vmatprep.subr.bf16.mxu1 %v4302_v1  ;;  %v4393_v1 = vld [vmem:[#allocation4 + $0x544] ss:$16 sps:$4 sm:$0xff]  }
  0xa9   :  { %1537 = vmatpush1.bf16.msra.mxu0 %v4297_v2  ;;  %v4396_v2 = vld [vmem:[#allocation4 + $0x52c] ss:$16 sps:$4 sm:$0xff]  }
  0xaa   :  { %1827 = vmatpush1.bf16.msra.mxu1 %v4300_v3  ;;  %1538 = vmatprep.subr.bf16.mxu0 %v4306_v4  ;;  %v4391_v3 = vld [vmem:[#allocation4 + $0x540] ss:$16 sps:$4 sm:$0xff]   ;;  %v4394_v4 = vld [vmem:[#allocation4 + $0x528] ss:$16 sps:$4 sm:$0xff]  }
  0xab   :  { %1828 = vmatprep.subr.bf16.mxu1 %v4309_v5  ;;  %v4399_v5 = vld [vmem:[#allocation4 + $0x564] ss:$16 sps:$4 sm:$0xff]  }
  0xad   :  { %1539 = vmatpush1.bf16.msra.mxu0 %v4304_v6  ;;  %v4402_v6 = vld [vmem:[#allocation4 + $0x54c] ss:$16 sps:$4 sm:$0xff]  }
  0xae   :  { %1829 = vmatpush1.bf16.msra.mxu1 %v4307_v7  ;;  %1540 = vmatprep.subr.bf16.mxu0 %v4314_v8  ;;  %v4397_v7 = vld [vmem:[#allocation4 + $0x560] ss:$16 sps:$4 sm:$0xff]   ;;  %v4400_v8 = vld [vmem:[#allocation4 + $0x548] ss:$16 sps:$4 sm:$0xff]  }
  0xaf   :  { %1830 = vmatprep.subr.bf16.mxu1 %v4317_v9  ;;  %v4408_v9 = vld [vmem:[#allocation4 + $0x584] ss:$16 sps:$4 sm:$0xff]  }
  0xb1   :  { %1541 = vmatpush1.bf16.msra.mxu0 %v4312_v10  ;;  %v4411_v10 = vld [vmem:[#allocation4 + $0x56c] ss:$16 sps:$4 sm:$0xff]  }
  0xb2   :  { %1831 = vmatpush1.bf16.msra.mxu1 %v4315_v11  ;;  %1542 = vmatprep.subr.bf16.mxu0 %v4321_v12  ;;  %v4406_v11 = vld [vmem:[#allocation4 + $0x580] ss:$16 sps:$4 sm:$0xff]   ;;  %v4409_v12 = vld [vmem:[#allocation4 + $0x568] ss:$16 sps:$4 sm:$0xff]  }
  0xb3   :  { %1832 = vmatprep.subr.bf16.mxu1 %v4324_v13  ;;  %v4414_v13 = vld [vmem:[#allocation4 + $0x5a4] ss:$16 sps:$4 sm:$0xff]  }
  0xb5   :  { %1543 = vmatpush1.bf16.msra.mxu0 %v4319_v14  ;;  %v4417_v14 = vld [vmem:[#allocation4 + $0x58c] ss:$16 sps:$4 sm:$0xff]  }
  0xb6   :  { %1833 = vmatpush1.bf16.msra.mxu1 %v4322_v15  ;;  %1585 = vmatprep.subr.bf16.mxu0 %v4330_v16  ;;  %v4412_v15 = vld [vmem:[#allocation4 + $0x5a0] ss:$16 sps:$4 sm:$0xff]   ;;  %v4415_v16 = vld [vmem:[#allocation4 + $0x588] ss:$16 sps:$4 sm:$0xff]  }
  0xb7   :  { %1834 = vmatprep.subr.bf16.mxu1 %v4333_v17  ;;  %v4423_v17 = vld [vmem:[#allocation4 + $0x5c4] ss:$16 sps:$4 sm:$0xff]  }
  0xb8   :  { %1545 = vmatmul.mubr.bf16.vlgmr.msra.gmra.mrb[0].mxu0 %v4325_v18 }
  0xb9   :  { %1586 = vmatpush1.bf16.msra.mxu0 %v4328_v19  ;;  %1554 = vmatprep.mubr.bf16.mxu0 %v4388_v23  ;;  %v4421_v19 = vld [vmem:[#allocation4 + $0x5c0] ss:$16 sps:$4 sm:$0xff]  }
  0xba   :  { %1835 = vmatpush1.bf16.msra.mxu1 %v4331_v20  ;;  %1587 = vmatprep.subr.bf16.mxu0 %v4336_v21  ;;  %v4424_v20 = vld [vmem:[#allocation4 + $0x5a8] ss:$16 sps:$4 sm:$0xff]   ;;  %v4429_v21 = vld [vmem:[#allocation4 + $0x5e4] ss:$16 sps:$4 sm:$0xff]  }
  0xbb   :  { %1877 = vmatprep.subr.bf16.mxu1 %v4339_v22  ;;  %v4432_v22 = vld [vmem:[#allocation4 + $0x5cc] ss:$16 sps:$4 sm:$0xff]  }
  0xbd   :  { %1837 = vmatmul.mubr.bf16.vlgmr.msra.gmra.mrb[16].mxu1 %v4325_v18  ;;  %1588 = vmatpush1.bf16.msra.mxu0 %v4334_v24  ;;  %v4426_v18 = vld [vmem:[#allocation4 + $0x5ac] ss:$16 sps:$4 sm:$0xff]   ;;  %v4430_v24 = vld [vmem:[#allocation4 + $0x5c8] ss:$16 sps:$4 sm:$0xff]  }
  0xbe   :  { %1878 = vmatpush1.bf16.msra.mxu1 %v4337_v25  ;;  %1589 = vmatprep.subr.bf16.mxu0 %v4342_v26  ;;  %v4438_v25 = vld [vmem:[#allocation4 + $0x5ec] ss:$16 sps:$4 sm:$0xff]  }
  0xbf   :  { %1879 = vmatprep.subr.bf16.mxu1 %v4345_v27  ;;  %1846 = vmatprep.mubr.bf16.mxu1 %v4388_v23  ;;  %v4427_v23 = vld [vmem:[#allocation4 + $0x5e0] ss:$16 sps:$4 sm:$0xff]   ;;  %v4436_v27 = vld [vmem:[#allocation4 + $0x5e8] ss:$16 sps:$4 sm:$0xff]  }
  0xc0   :  { %1555 = vmatmul.mubr.bf16.gmra.mrb[4].mxu0 %v4390_v30  ;;  %v4433_v26 = vld [vmem:[#allocation2 + $0x10] ss:$28 sps:$4 sm:$0xff]  }
  0xc1   :  { %1590 = vmatpush1.bf16.msra.mxu0 %v4340_v28  ;;  %1564 = vmatprep.mubr.bf16.mxu0 %v4403_v33  ;;  %v4442_v28 = vld [vmem:[#allocation2 + $0x4c] ss:$28 sps:$4 sm:$0xff]  }
  0xc2   :  { %1880 = vmatpush1.bf16.msra.mxu1 %v4343_v29  ;;  %1591 = vmatprep.subr.bf16.mxu0 %v4348_v31  ;;  %v4441_v29 = vld [vmem:[#allocation4 + $0x60c] ss:$16 sps:$4 sm:$0xff]   ;;  %v4444_v31 = vld [vmem:[#allocation2 + $0x48] ss:$28 sps:$4 sm:$0xff]  }
  0xc3   :  { %1881 = vmatprep.subr.bf16.mxu1 %v4351_v32  ;;  %v4445_v32 = vld [vmem:[#allocation2 + $0x84] ss:$28 sps:$4 sm:$0xff]  }
  0xc5   :  { %1847 = vmatmul.mubr.bf16.gmra.mrb[20].mxu1 %v4390_v30  ;;  %1592 = vmatpush1.bf16.msra.mxu0 %v4346_v34  ;;  %v4439_v30 = vld [vmem:[#allocation4 + $0x608] ss:$16 sps:$4 sm:$0xff]  }
  0xc6   :  { %1882 = vmatpush1.bf16.msra.mxu1 %v4349_v35  ;;  %1593 = vmatprep.subr.bf16.mxu0 %v4354_v36  ;;  %v4448_v34 = vld [vmem:[#allocation2 + $0xbc] ss:$28 sps:$4 sm:$0xff]  }
  0xc7   :  { %1883 = vmatprep.subr.bf16.mxu1 %v4357_v37  ;;  %1856 = vmatprep.mubr.bf16.mxu1 %v4403_v33  ;;  %v4447_v33 = vld [vmem:[#allocation2 + $0x80] ss:$28 sps:$4 sm:$0xff]   ;;  %v4450_v35 = vld [vmem:[#allocation2 + $0xb8] ss:$28 sps:$4 sm:$0xff]  }
  0xc8   :  { %1565 = vmatmul.mubr.bf16.gmra.mrb[8].mxu0 %v4405_v40 }
  0xc9   :  { %1594 = vmatpush1.bf16.msra.mxu0 %v4352_v38  ;;  %1574 = vmatprep.mubr.bf16.mxu0 %v4418_v43 }
  0xca   :  { %1884 = vmatpush1.bf16.msra.mxu1 %v4355_v39  ;;  %1595 = vmatprep.subr.bf16.mxu0 %v4360_v41  ;;  %v4586_v41 = vld [vmem:[#allocation2 + $0x50] ss:$28 sps:$4 sm:$0xff]  }
  0xcb   :  { %1885 = vmatprep.subr.bf16.mxu1 %v4363_v42 }
  0xcd   :  { %1857 = vmatmul.mubr.bf16.gmra.mrb[24].mxu1 %v4405_v40  ;;  %1596 = vmatpush1.bf16.msra.mxu0 %v4358_v44  ;;  %v4585_v40 = vld [vmem:[#allocation2 + $0x18] ss:$28 sps:$4 sm:$0xff]   ;;  %v4587_v44 = vld [vmem:[#allocation2 + $0x88] ss:$28 sps:$4 sm:$0xff]  }
  0xce   :  { %1886 = vmatpush1.bf16.msra.mxu1 %v4361_v45  ;;  %1597 = vmatprep.subr.bf16.mxu0 %v4366_v46 }
  0xcf   :  { %1887 = vmatprep.subr.bf16.mxu1 %v4369_v47  ;;  %1866 = vmatprep.mubr.bf16.mxu1 %v4418_v43 }
  0xd0   :  { %1575 = vmatmul.mubr.bf16.gmra.mrb[12].mxu0 %v4420_v52 }
  0xd1   :  { %1598 = vmatpush1.bf16.msra.mxu0 %v4364_v48  ;;  %1617 = vmatprep.mubr.bf16.mxu0 %v4435_v53 }
  0xd2   :  { %1888 = vmatpush1.bf16.msra.mxu1 %v4367_v49  ;;  %1599 = vmatprep.subr.bf16.mxu0 %v4372_v50  ;;  %v4588_v49 = vld [vmem:[#allocation2 + $0xc0] ss:$28 sps:$4 sm:$0xff]  }
  0xd3   :  { %1889 = vmatprep.subr.bf16.mxu1 %v4375_v51 }
  0xd5   :  { %1867 = vmatmul.mubr.bf16.gmra.mrb[28].mxu1 %v4420_v52  ;;  %1600 = vmatpush1.bf16.msra.mxu0 %v4370_v54 }
  0xd6   :  { %1890 = vmatpush1.bf16.msra.mxu1 %v4373_v55  ;;  %1601 = vmatprep.subr.bf16.mxu0 %v4378_v56  ;;  %v4453_v55 = vld [vmem:[#allocation4 + $0x624] ss:$16 sps:$4 sm:$0xff]   ;;  %v4451_v56 = vld [vmem:[#allocation4 + $0x620] ss:$16 sps:$4 sm:$0xff]  }
  0xd7   :  { %1891 = vmatprep.subr.bf16.mxu1 %v4381_v57  ;;  %1909 = vmatprep.mubr.bf16.mxu1 %v4435_v53  ;;  %v4456_v57 = vld [vmem:[#allocation4 + $0x644] ss:$16 sps:$4 sm:$0xff]  }
  0xd9   :  { %1602 = vmatpush1.bf16.msra.mxu0 %v4376_v58  ;;  %v4454_v58 = vld [vmem:[#allocation4 + $0x640] ss:$16 sps:$4 sm:$0xff]  }
  0xda   :  { %1892 = vmatpush1.bf16.msra.mxu1 %v4379_v59  ;;  %1603 = vmatprep.subr.bf16.mxu0 %v4384_v60  ;;  %v4459_v59 = vld [vmem:[#allocation4 + $0x664] ss:$16 sps:$4 sm:$0xff]   ;;  %v4457_v60 = vld [vmem:[#allocation4 + $0x660] ss:$16 sps:$4 sm:$0xff]  }
  0xdb   :  { %1893 = vmatprep.subr.bf16.mxu1 %v4387_v61  ;;  %v4462_v61 = vld [vmem:[#allocation4 + $0x684] ss:$16 sps:$4 sm:$0xff]  }
  0xdd   :  { %1604 = vmatpush1.bf16.msra.mxu0 %v4382_v62  ;;  %v4460_v62 = vld [vmem:[#allocation4 + $0x680] ss:$16 sps:$4 sm:$0xff]  }
  0xde   :  { %1894 = vmatpush1.bf16.msra.mxu1 %v4385_v63  ;;  %1605 = vmatprep.subr.bf16.mxu0 %v4393_v1  ;;  %v4465_v63 = vld [vmem:[#allocation4 + $0x6a4] ss:$16 sps:$4 sm:$0xff]   ;;  %v4463_v1 = vld [vmem:[#allocation4 + $0x6a0] ss:$16 sps:$4 sm:$0xff]  }
  0xdf   :  { %1895 = vmatprep.subr.bf16.mxu1 %v4396_v2  ;;  %v4468_v2 = vld [vmem:[#allocation4 + $0x6c4] ss:$16 sps:$4 sm:$0xff]  }
  0xe1   :  { %1606 = vmatpush1.bf16.msra.mxu0 %v4391_v3  ;;  %v4466_v3 = vld [vmem:[#allocation4 + $0x6c0] ss:$16 sps:$4 sm:$0xff]  }
  0xe2   :  { %1896 = vmatpush1.bf16.msra.mxu1 %v4394_v4  ;;  %1607 = vmatprep.subr.bf16.mxu0 %v4399_v5  ;;  %v4471_v4 = vld [vmem:[#allocation4 + $0x6e4] ss:$16 sps:$4 sm:$0xff]   ;;  %v4469_v5 = vld [vmem:[#allocation4 + $0x6e0] ss:$16 sps:$4 sm:$0xff]  }
  0xe3   :  { %1897 = vmatprep.subr.bf16.mxu1 %v4402_v6  ;;  %v4474_v6 = vld [vmem:[#allocation4 + $0x704] ss:$16 sps:$4 sm:$0xff]  }
  0xe5   :  { %1608 = vmatpush1.bf16.msra.mxu0 %v4397_v7  ;;  %v4472_v7 = vld [vmem:[#allocation4 + $0x700] ss:$16 sps:$4 sm:$0xff]  }
  0xe6   :  { %1898 = vmatpush1.bf16.msra.mxu1 %v4400_v8  ;;  %1609 = vmatprep.subr.bf16.mxu0 %v4408_v9  ;;  %v4477_v8 = vld [vmem:[#allocation4 + $0x724] ss:$16 sps:$4 sm:$0xff]   ;;  %v4475_v9 = vld [vmem:[#allocation4 + $0x720] ss:$16 sps:$4 sm:$0xff]  }
  0xe7   :  { %1899 = vmatprep.subr.bf16.mxu1 %v4411_v10  ;;  %v4480_v10 = vld [vmem:[#allocation4 + $0x744] ss:$16 sps:$4 sm:$0xff]  }
  0xe9   :  { %1610 = vmatpush1.bf16.msra.mxu0 %v4406_v11  ;;  %v4478_v11 = vld [vmem:[#allocation4 + $0x740] ss:$16 sps:$4 sm:$0xff]  }
  0xea   :  { %1900 = vmatpush1.bf16.msra.mxu1 %v4409_v12  ;;  %1611 = vmatprep.subr.bf16.mxu0 %v4414_v13  ;;  %v4483_v12 = vld [vmem:[#allocation4 + $0x764] ss:$16 sps:$4 sm:$0xff]   ;;  %v4481_v13 = vld [vmem:[#allocation4 + $0x760] ss:$16 sps:$4 sm:$0xff]  }
  0xeb   :  { %1901 = vmatprep.subr.bf16.mxu1 %v4417_v14  ;;  %v4486_v14 = vld [vmem:[#allocation4 + $0x784] ss:$16 sps:$4 sm:$0xff]  }
  0xed   :  { %1612 = vmatpush1.bf16.msra.mxu0 %v4412_v15  ;;  %v4484_v15 = vld [vmem:[#allocation4 + $0x780] ss:$16 sps:$4 sm:$0xff]  }
  0xee   :  { %1902 = vmatpush1.bf16.msra.mxu1 %v4415_v16  ;;  %1613 = vmatprep.subr.bf16.mxu0 %v4423_v17  ;;  %v4489_v16 = vld [vmem:[#allocation4 + $0x7a4] ss:$16 sps:$4 sm:$0xff]   ;;  %v4487_v17 = vld [vmem:[#allocation4 + $0x7a0] ss:$16 sps:$4 sm:$0xff]  }
  0xef   :  { %1903 = vmatprep.subr.bf16.mxu1 %v4426_v18  ;;  %v4492_v18 = vld [vmem:[#allocation4 + $0x7c4] ss:$16 sps:$4 sm:$0xff]  }
  0xf1   :  { %1614 = vmatpush1.bf16.msra.mxu0 %v4421_v19  ;;  %v4490_v19 = vld [vmem:[#allocation4 + $0x7c0] ss:$16 sps:$4 sm:$0xff]  }
  0xf2   :  { %1904 = vmatpush1.bf16.msra.mxu1 %v4424_v20  ;;  %1615 = vmatprep.subr.bf16.mxu0 %v4429_v21  ;;  %v286_v20 = vlaneseq  ;;  %v4495_v21 = vld [vmem:[#allocation4 + $0x7e4] ss:$16 sps:$4 sm:$0xff]  }
  0xf3   :  { %1905 = vmatprep.subr.bf16.mxu1 %v4432_v22  ;;  %v4493_v22 = vld [vmem:[#allocation4 + $0x7e0] ss:$16 sps:$4 sm:$0xff]  }
  0xf5   :  { %1616 = vmatpush1.bf16.msra.mxu0 %v4427_v23  ;;  %v4774_v23 = vshrl.u32 %v286_v20, 7 }
  0xf6   :  { %1906 = vmatpush1.bf16.msra.mxu1 %v4430_v24  ;;  %2796 = vmatprep.subr.bf16.mxu0 %v4453_v55  ;;  %v4498_v24 = vld [vmem:[#allocation4 + $0x804] ss:$16 sps:$4 sm:$0xff]  }
  0xf7   :  { %1907 = vmatprep.subr.bf16.mxu1 %v4438_v25  ;;  %v4496_v25 = vld [vmem:[#allocation4 + $0x800] ss:$16 sps:$4 sm:$0xff]  }
  0xf8   :  { %1618 = vmatmul.mubr.bf16.vlgmr.msra.gmra.mrb[0].mxu0 %v4433_v26 }
  0xf9   :  { %1627 = vmatprep.mubr.bf16.mxu0 %v4442_v28  ;;  %2797 = vmatpush1.bf16.msra.mxu0 %v4451_v56 }
  0xfa   :  { %1908 = vmatpush1.bf16.msra.mxu1 %v4436_v27  ;;  %2798 = vmatprep.subr.bf16.mxu0 %v4456_v57  ;;  %v4779_v27 = vld [vmem:[#allocation6] ss:$8 sm:$0xf] }
  0xfb   :  { %1950 = vmatprep.subr.bf16.mxu1 %v4441_v29  ;;  %v4501_v29 = vld [vmem:[#allocation4 + $0x824] ss:$16 sps:$4 sm:$0xff]  }
  0xfd   :  { %1910 = vmatmul.mubr.bf16.vlgmr.msra.gmra.mrb[16].mxu1 %v4433_v26  ;;  %2799 = vmatpush1.bf16.msra.mxu0 %v4454_v58  ;;  %v4777_v26 = vsub.s32 0, %v4774_v23 }
  0xfe   :  { %1951 = vmatpush1.bf16.msra.mxu1 %v4439_v30  ;;  %1919 = vmatprep.mubr.bf16.mxu1 %v4442_v28  ;;  %v4782_v28 = vsub.s32 1, %v4774_v23 }
  0xff   :  { %2800 = vmatprep.subr.bf16.mxu0 %v4459_v59  ;;  %v4786_v30 = vrot.slane %v4779_v27, %v4777_v26 }
 0x100   :  { %1628 = vmatmul.mubr.bf16.gmra.mrb[4].mxu0 %v4444_v31 }
 0x101   :  { %1637 = vmatprep.mubr.bf16.mxu0 %v4445_v32  ;;  %2801 = vmatpush1.bf16.msra.mxu0 %v4457_v60 }
 0x102   :  { %2802 = vmatprep.subr.bf16.mxu0 %v4462_v61 }
 0x105   :  { %1920 = vmatmul.mubr.bf16.gmra.mrb[20].mxu1 %v4444_v31  ;;  %2803 = vmatpush1.bf16.msra.mxu0 %v4460_v62  ;;  %v4790_v31 = vrot.slane %v4779_v27, %v4782_v28 }
 0x106   :  { %1929 = vmatprep.mubr.bf16.mxu1 %v4445_v32  ;;  %2804 = vmatprep.subr.bf16.mxu0 %v4465_v63 }
 0x108   :  { %1638 = vmatmul.mubr.bf16.gmra.mrb[8].mxu0 %v4447_v33 }
 0x109   :  { %1647 = vmatprep.mubr.bf16.mxu0 %v4448_v34  ;;  %2805 = vmatpush1.bf16.msra.mxu0 %v4463_v1 }
 0x10a   :  { %2806 = vmatprep.subr.bf16.mxu0 %v4468_v2 }
 0x10d   :  { %1930 = vmatmul.mubr.bf16.gmra.mrb[24].mxu1 %v4447_v33  ;;  %2807 = vmatpush1.bf16.msra.mxu0 %v4466_v3 }
 0x10e   :  { %1939 = vmatprep.mubr.bf16.mxu1 %v4448_v34  ;;  %2808 = vmatprep.subr.bf16.mxu0 %v4471_v4 }
 0x110   :  { %v4734_v36 = vpop.f32.mrb[0].mxu1  ;;  %1648 = vmatmul.mubr.bf16.gmra.mrb[12].mxu0 %v4450_v35 }
 0x111   :  { %v4736_v37 = vpop.f32.mrb[1].mxu1  ;;  %2809 = vmatpush1.bf16.msra.mxu0 %v4469_v5 }
 0x112   :  { %v4738_v38 = vpop.f32.mrb[2].mxu1  ;;  %2810 = vmatprep.subr.bf16.mxu0 %v4474_v6 }
 0x113   :  { %v4740_v39 = vpop.f32.mrb[3].mxu1 }
 0x115   :  { %1940 = vmatmul.mubr.bf16.gmra.mrb[28].mxu1 %v4450_v35  ;;  %2811 = vmatpush1.bf16.msra.mxu0 %v4472_v7 }
 0x116   :  { %1982 = vmatprep.mubr.bf16.mxu1 %v4668_v0  ;;  %2812 = vmatprep.subr.bf16.mxu0 %v4477_v8 }
 0x118   :  { %v4747_v42 = vpop.f32.mrb[4].mxu1 }
 0x119   :  { %v4749_v43 = vpop.f32.mrb[5].mxu1  ;;  %2813 = vmatpush1.bf16.msra.mxu0 %v4475_v9 }
 0x11a   :  { %v4752_v45 = vpop.f32.mrb[6].mxu1  ;;  %2814 = vmatprep.subr.bf16.mxu0 %v4480_v10 }
 0x11b   :  { %v4755_v46 = vpop.f32.mrb[7].mxu1 }
 0x11d   :  { %3778 = vmatmul.mubr.msk.bf16.vlgmr.msra.gmra.mrb[16].mxu1 %vm1426_vm0, %v4585_v40  ;;  %2815 = vmatpush1.bf16.msra.mxu0 %v4478_v11 }
 0x11e   :  { %1992 = vmatprep.mubr.bf16.mxu1 %v4668_v0  ;;  %2816 = vmatprep.subr.bf16.mxu0 %v4483_v12 }
 0x120   :  { %v4757_v47 = vpop.f32.mrb[8].mxu1 }
 0x121   :  { %v4759_v48 = vpop.f32.mrb[9].mxu1  ;;  %2817 = vmatpush1.bf16.msra.mxu0 %v4481_v13 }
 0x122   :  { %v4762_v50 = vpop.f32.mrb[10].mxu1  ;;  %2818 = vmatprep.subr.bf16.mxu0 %v4486_v14 }
 0x123   :  { %v4764_v51 = vpop.f32.mrb[11].mxu1 }
 0x125   :  { %3779 = vmatmul.mubr.msk.bf16.gmra.mrb[20].mxu1 %vm1426_vm0, %v4586_v41  ;;  %2819 = vmatpush1.bf16.msra.mxu0 %v4484_v15 }
 0x126   :  { %2002 = vmatprep.mubr.bf16.mxu1 %v4668_v0  ;;  %2820 = vmatprep.subr.bf16.mxu0 %v4489_v16 }
 0x128   :  { %v4766_v52 = vpop.f32.mrb[12].mxu1 }
 0x129   :  { %v4768_v53 = vpop.f32.mrb[13].mxu1  ;;  %2821 = vmatpush1.bf16.msra.mxu0 %v4487_v17 }
 0x12a   :  { %v4770_v54 = vpop.f32.mrb[14].mxu1  ;;  %2822 = vmatprep.subr.bf16.mxu0 %v4492_v18 }
 0x12d   :  { %3780 = vmatmul.mubr.msk.bf16.gmra.mrb[24].mxu1 %vm1426_vm0, %v4587_v44  ;;  %2823 = vmatpush1.bf16.msra.mxu0 %v4490_v19 }
 0x12e   :  { %2012 = vmatprep.mubr.bf16.mxu1 %v4668_v0  ;;  %v4772_v0 = vpop.f32.mrb[15].mxu1  ;;  %2824 = vmatprep.subr.bf16.mxu0 %v4495_v21 }
 0x131   :  { %2825 = vmatpush1.bf16.msra.mxu0 %v4493_v22 }
 0x132   :  { %2826 = vmatprep.subr.bf16.mxu0 %v4498_v24 }
 0x135   :  { %3781 = vmatmul.mubr.msk.bf16.gmra.mrb[28].mxu1 %vm1426_vm0, %v4588_v49  ;;  %2827 = vmatpush1.bf16.msra.mxu0 %v4496_v25 }
 0x136   :  { %2869 = vmatprep.subr.bf16.mxu0 %v4501_v29 }
 0x1cb   :  { %v1619_v32 = vpop.f32.mrb[0].mxu0 }
 0x1cc   :  { %v3946_v33 = vadd.f32 %v1619_v32, %v4786_v30  ;;  %v1621_v34 = vpop.f32.mrb[1].mxu0 }
 0x1cd   :  { %v3948_v35 = vadd.f32 %v1621_v34, %v4790_v31  ;;  %v1623_v40 = vpop.f32.mrb[2].mxu0 }
 0x1ce   :  { %v3947_v41 = vadd.f32 %v3946_v33, %v4734_v36  ;;  %v3950_v44 = vadd.f32 %v1623_v40, %v4786_v30  ;;  %v1625_v49 = vpop.f32.mrb[3].mxu0 }
 0x1cf   :  { %v3949_v55 = vadd.f32 %v3948_v35, %v4736_v37  ;;  %v3952_v56 = vadd.f32 %v1625_v49, %v4790_v31 }
 0x1d0   :  { %v4798_v57 = vmax.f32 %v3947_v41, 0.0  ;;  %v3951_v58 = vadd.f32 %v3950_v44, %v4738_v38 }
 0x1d1   :  { %v4801_v59 = vmax.f32 %v3949_v55, 0.0  ;;  %v3953_v60 = vadd.f32 %v3952_v56, %v4740_v39 }
 0x1d2   :  { %v4804_v61 = vmax.f32 %v3951_v58, 0.0  ;;  %v2107_v63 = vmul.f32 %v4798_v57, %v4798_v57 }
 0x1d3   :  { %v4806_v62 = vmax.f32 %v3953_v60, 0.0  ;;  %v1629_v36 = vpop.f32.mrb[4].mxu0  ;;  %v2108_v39 = vmul.f32 %v4801_v59, %v4801_v59 }
 0x1d4   :  { %v2055_v37 = vadd.f32 %v4804_v61, %v4798_v57  ;;  %v2111_v1 = vmul.f32 %v4804_v61, %v4804_v61  ;;  %v3954_v38 = vadd.f32 %v1629_v36, %v4786_v30  ;;  %v1631_v2 = vpop.f32.mrb[5].mxu0 }
 0x1d5   :  { %v2068_v3 = vadd.f32 %v4806_v62, %v4801_v59  ;;  %v2112_v4 = vmul.f32 %v4806_v62, %v4806_v62  ;;  %v3956_v5 = vadd.f32 %v1631_v2, %v4790_v31  ;;  %v1633_v6 = vpop.f32.mrb[6].mxu0 }
 0x1d6   :  { %v2139_v7 = vadd.f32 %v2111_v1, %v2107_v63  ;;  %v3955_v8 = vadd.f32 %v3954_v38, %v4747_v42  ;;  %v3958_v9 = vadd.f32 %v1633_v6, %v4786_v30  ;;  %v1635_v10 = vpop.f32.mrb[7].mxu0 }
 0x1d7   :  { %v2152_v11 = vadd.f32 %v2112_v4, %v2108_v39  ;;  %v3957_v12 = vadd.f32 %v3956_v5, %v4749_v43  ;;  %v3960_v13 = vadd.f32 %v1635_v10, %v4790_v31 }
 0x1d8   :  { %v4826_v14 = vmax.f32 %v3955_v8, 0.0  ;;  %v3959_v15 = vadd.f32 %v3958_v9, %v4752_v45 }
 0x1d9   :  { %v4829_v16 = vmax.f32 %v3957_v12, 0.0  ;;  %v3961_v17 = vadd.f32 %v3960_v13, %v4755_v46 }
 0x1da   :  { %v2056_v18 = vadd.f32 %v2055_v37, %v4826_v14  ;;  %v2115_v42 = vmul.f32 %v4826_v14, %v4826_v14  ;;  %v4835_v19 = vmax.f32 %v3959_v15, 0.0 }
 0x1db   :  { %v2069_v20 = vadd.f32 %v2068_v3, %v4829_v16  ;;  %v2116_v43 = vmul.f32 %v4829_v16, %v4829_v16  ;;  %v4840_v21 = vmax.f32 %v3961_v17, 0.0  ;;  %v1639_v22 = vpop.f32.mrb[8].mxu0 }
 0x1dc   :  { %v2140_v45 = vadd.f32 %v2139_v7, %v2115_v42  ;;  %v2057_v24 = vadd.f32 %v2056_v18, %v4835_v19  ;;  %v2119_v46 = vmul.f32 %v4835_v19, %v4835_v19  ;;  %v3962_v25 = vadd.f32 %v1639_v22, %v4786_v30  ;;  %v1641_v29 = vpop.f32.mrb[9].mxu0 }
 0x1dd   :  { %v2153_v32 = vadd.f32 %v2152_v11, %v2116_v43  ;;  %v2070_v33 = vadd.f32 %v2069_v20, %v4840_v21  ;;  %v2120_v34 = vmul.f32 %v4840_v21, %v4840_v21  ;;  %v3964_v35 = vadd.f32 %v1641_v29, %v4790_v31  ;;  %v1643_v40 = vpop.f32.mrb[10].mxu0 }
 0x1de   :  { %v2141_v41 = vadd.f32 %v2140_v45, %v2119_v46  ;;  %v3963_v44 = vadd.f32 %v3962_v25, %v4757_v47  ;;  %v3966_v49 = vadd.f32 %v1643_v40, %v4786_v30  ;;  %v1645_v55 = vpop.f32.mrb[11].mxu0 }
 0x1df   :  { %v2154_v56 = vadd.f32 %v2153_v32, %v2120_v34  ;;  %v3965_v58 = vadd.f32 %v3964_v35, %v4759_v48  ;;  %v3968_v60 = vadd.f32 %v1645_v55, %v4790_v31 }
 0x1e0   :  { %v4854_v36 = vmax.f32 %v3963_v44, 0.0  ;;  %v3967_v63 = vadd.f32 %v3966_v49, %v4762_v50 }
 0x1e1   :  { %v4857_v37 = vmax.f32 %v3965_v58, 0.0  ;;  %v3969_v1 = vadd.f32 %v3968_v60, %v4764_v51 }
 0x1e2   :  { %v2058_v38 = vadd.f32 %v2057_v24, %v4854_v36  ;;  %v2123_v47 = vmul.f32 %v4854_v36, %v4854_v36  ;;  %v4863_v2 = vmax.f32 %v3967_v63, 0.0  ;;  %v4886_v24 = vsub.s32 2, %v4774_v23 }
 0x1e3   :  { %v2071_v39 = vadd.f32 %v2070_v33, %v4857_v37  ;;  %v2124_v48 = vmul.f32 %v4857_v37, %v4857_v37  ;;  %v4868_v3 = vmax.f32 %v3969_v1, 0.0  ;;  %v1649_v4 = vpop.f32.mrb[12].mxu0 }
 0x1e4   :  { %v2142_v50 = vadd.f32 %v2141_v41, %v2123_v47  ;;  %v2059_v5 = vadd.f32 %v2058_v38, %v4863_v2  ;;  %v2127_v51 = vmul.f32 %v4863_v2, %v4863_v2  ;;  %v3970_v6 = vadd.f32 %v1649_v4, %v4786_v30  ;;  %v1651_v7 = vpop.f32.mrb[13].mxu0 }
 0x1e5   :  { %v2155_v8 = vadd.f32 %v2154_v56, %v2124_v48  ;;  %v2072_v9 = vadd.f32 %v2071_v39, %v4868_v3  ;;  %v2128_v10 = vmul.f32 %v4868_v3, %v4868_v3  ;;  %v3972_v11 = vadd.f32 %v1651_v7, %v4790_v31  ;;  %v1653_v12 = vpop.f32.mrb[14].mxu0 }
 0x1e6   :  { %v2143_v13 = vadd.f32 %v2142_v50, %v2127_v51  ;;  %v3971_v15 = vadd.f32 %v3970_v6, %v4766_v52  ;;  %v3974_v17 = vadd.f32 %v1653_v12, %v4786_v30  ;;  %v1655_v18 = vpop.f32.mrb[15].mxu0  ;;  %v4892_v52 = vsub.s32 3, %v4774_v23 }
 0x1e7   :  { %v2156_v42 = vadd.f32 %v2155_v8, %v2128_v10  ;;  %v3973_v20 = vadd.f32 %v3972_v11, %v4768_v53  ;;  %v3976_v43 = vadd.f32 %v1655_v18, %v4790_v31  ;;  %v4909_v35 = vrot.slane %v4779_v27, %v4886_v24 }
 0x1e8   :  { %v4882_v22 = vmax.f32 %v3971_v15, 0.0  ;;  %v3975_v45 = vadd.f32 %v3974_v17, %v4770_v54  ;;  %v4916_v49 = vrot.slane %v4779_v27, %v4892_v52 }
 0x1e9   :  { %v4888_v46 = vmax.f32 %v3973_v20, 0.0  ;;  %v3977_v25 = vadd.f32 %v3976_v43, %v4772_v0 }
 0x1ea   :  { %v2060_v30 = vadd.f32 %v2059_v5, %v4882_v22  ;;  %v2131_v53 = vmul.f32 %v4882_v22, %v4882_v22  ;;  %v4897_v31 = vmax.f32 %v3975_v45, 0.0 }
 0x1eb   :  { %v2073_v29 = vadd.f32 %v2072_v9, %v4888_v46  ;;  %v2132_v54 = vmul.f32 %v4888_v46, %v4888_v46  ;;  %v4902_v32 = vmax.f32 %v3977_v25, 0.0 }
 0x1ec   :  { %v2144_v33 = vadd.f32 %v2143_v13, %v2131_v53  ;;  %v2061_v0 = vadd.f32 %v2060_v30, %v4897_v31  ;;  %v2135_v34 = vmul.f32 %v4897_v31, %v4897_v31 }
 0x1ed   :  { %v2157_v40 = vadd.f32 %v2156_v42, %v2132_v54  ;;  %v2074_v41 = vadd.f32 %v2073_v29, %v4902_v32  ;;  %v2136_v44 = vmul.f32 %v4902_v32, %v4902_v32 }
 0x1ee   :  { %v2062_v55 = vrot.slane %v2061_v0, 4  ;;  %v2145_v56 = vadd.f32 %v2144_v33, %v2135_v34 }
 0x1ef   :  { %v2075_v58 = vrot.slane %v2074_v41, 4  ;;  %v2158_v60 = vadd.f32 %v2157_v40, %v2136_v44 }
 0x1f0   :  { %v1984_v63 = vpop.f32.mrb[16].mxu1  ;;  %v2063_v1 = vadd.f32 %v2062_v55, %v2061_v0  ;;  %v2146_v38 = vrot.slane %v2145_v56, 4 }
 0x1f1   :  { %v3978_v47 = vadd.f32 %v1984_v63, %v4909_v35  ;;  %v1986_v39 = vpop.f32.mrb[17].mxu1  ;;  %v2076_v48 = vadd.f32 %v2075_v58, %v2074_v41  ;;  %v2159_v4 = vrot.slane %v2158_v60, 4 }
 0x1f2   :  { %v3979_v50 = vadd.f32 %v1986_v39, %v4916_v49  ;;  %v1988_v5 = vpop.f32.mrb[18].mxu1  ;;  %v2064_v51 = vrot.slane %v2063_v1, 2  ;;  %v2147_v6 = vadd.f32 %v2146_v38, %v2145_v56 }
 0x1f3   :  { %v4920_v7 = vmax.f32 %v3978_v47, 0.0  ;;  %v3980_v27 = vadd.f32 %v1988_v5, %v4909_v35  ;;  %v1990_v8 = vpop.f32.mrb[19].mxu1  ;;  %v2077_v9 = vrot.slane %v2076_v48, 2  ;;  %v2160_v10 = vadd.f32 %v2159_v4, %v2158_v60 }
 0x1f4   :  { %v4923_v11 = vmax.f32 %v3979_v50, 0.0  ;;  %v3981_v12 = vadd.f32 %v1990_v8, %v4916_v49  ;;  %v2065_v13 = vadd.f32 %v2064_v51, %v2063_v1  ;;  %v2148_v15 = vrot.slane %v2147_v6, 2 }
 0x1f5   :  { %v2109_v17 = vmul.f32 %v4920_v7, %v4920_v7  ;;  %v4928_v18 = vmax.f32 %v3980_v27, 0.0  ;;  %v2078_v42 = vadd.f32 %v2077_v9, %v2076_v48  ;;  %v2161_v20 = vrot.slane %v2160_v10, 2 }
 0x1f6   :  { %v2110_v43 = vmul.f32 %v4923_v11, %v4923_v11  ;;  %v4932_v45 = vmax.f32 %v3981_v12, 0.0  ;;  %v2066_v25 = vrot.slane %v2065_v13, 1  ;;  %v2149_v30 = vadd.f32 %v2148_v15, %v2147_v6 }
 0x1f7   :  { %v2081_v53 = vadd.f32 %v4928_v18, %v4920_v7  ;;  %v2113_v29 = vmul.f32 %v4928_v18, %v4928_v18  ;;  %v2079_v54 = vrot.slane %v2078_v42, 1  ;;  %v2162_v33 = vadd.f32 %v2161_v20, %v2160_v10 }
 0x1f8   :  { %v2094_v0 = vadd.f32 %v4932_v45, %v4923_v11  ;;  %v2114_v34 = vmul.f32 %v4932_v45, %v4932_v45  ;;  %v1994_v40 = vpop.f32.mrb[20].mxu1  ;;  %v2067_v41 = vadd.f32 %v2066_v25, %v2065_v13  ;;  %v2150_v44 = vrot.slane %v2149_v30, 1 }
 0x1f9   :  { %v2165_v55 = vadd.f32 %v2113_v29, %v2109_v17  ;;  %v3982_v56 = vadd.f32 %v1994_v40, %v4909_v35  ;;  %v1996_v58 = vpop.f32.mrb[21].mxu1  ;;  %v2080_v60 = vadd.f32 %v2079_v54, %v2078_v42  ;;  %v2163_v63 = vrot.slane %v2162_v33, 1 }
 0x1fa   :  { %v2178_v1 = vadd.f32 %v2114_v34, %v2110_v43  ;;  %v3983_v38 = vadd.f32 %v1996_v58, %v4916_v49  ;;  %v1998_v47 = vpop.f32.mrb[22].mxu1  ;;  %v2151_v39 = vadd.f32 %v2150_v44, %v2149_v30  ;;  %v4944_v48 = vmul.f32 0.015625, %v2067_v41 }
 0x1fb   :  { %v4946_v4 = vmax.f32 %v3982_v56, 0.0  ;;  %v3984_v50 = vadd.f32 %v1998_v47, %v4909_v35  ;;  %v2000_v5 = vpop.f32.mrb[23].mxu1  ;;  %v2164_v51 = vadd.f32 %v2163_v63, %v2162_v33  ;;  %v4949_v6 = vmul.f32 0.015625, %v2080_v60 }
 0x1fc   :  { %v4951_v27 = vmax.f32 %v3983_v38, 0.0  ;;  %v3985_v8 = vadd.f32 %v2000_v5, %v4916_v49  ;;  %v2195_v9 = vmul.f32 0.015625, %v2151_v39  ;;  %v2199_v10 = vmul.f32 %v4944_v48, %v4944_v48 }
 0x1fd   :  { %v2082_v12 = vadd.f32 %v2081_v53, %v4946_v4  ;;  %v2117_v13 = vmul.f32 %v4946_v4, %v4946_v4  ;;  %v2196_v15 = vmul.f32 0.015625, %v2164_v51  ;;  %v2200_v17 = vmul.f32 %v4949_v6, %v4949_v6 }
 0x1fe   :  { %v2095_v42 = vadd.f32 %v2094_v0, %v4951_v27  ;;  %v2118_v20 = vmul.f32 %v4951_v27, %v4951_v27  ;;  %v2203_v43 = vsub.f32 %v2195_v9, %v2199_v10  ;;  %v4964_v30 = vmax.f32 %v3984_v50, 0.0 }
 0x1ff   :  { %v2166_v25 = vadd.f32 %v2165_v55, %v2117_v13  ;;  %v4966_v29 = vmax.f32 %v3985_v8, 0.0  ;;  %v2204_v54 = vsub.f32 %v2196_v15, %v2200_v17 }
 0x200   :  { %v2179_v53 = vadd.f32 %v2178_v1, %v2118_v20  ;;  %v2004_v33 = vpop.f32.mrb[24].mxu1  ;;  %v2207_v34 = vmax.f32 %v2203_v43, 0.0  ;;  %v2083_v40 = vadd.f32 %v2082_v12, %v4964_v30  ;;  %v2121_v41 = vmul.f32 %v4964_v30, %v4964_v30 }
 0x201   :  { %v2096_v0 = vadd.f32 %v2095_v42, %v4966_v29  ;;  %v2006_v44 = vpop.f32.mrb[25].mxu1  ;;  %v2208_v56 = vmax.f32 %v2204_v54, 0.0  ;;  %v2122_v55 = vmul.f32 %v4966_v29, %v4966_v29  ;;  %v3986_v58 = vadd.f32 %v2004_v33, %v4909_v35 }
 0x202   :  { %v3987_v60 = vadd.f32 %v2006_v44, %v4916_v49  ;;  %v2008_v63 = vpop.f32.mrb[26].mxu1  ;;  %v2215_v1 = vadd.f32 1e-05, %v2207_v34  ;;  %v2167_v38 = vadd.f32 %v2166_v25, %v2121_v41 }
 0x203   :  { %v3988_v47 = vadd.f32 %v2008_v63, %v4909_v35  ;;  %v2010_v39 = vpop.f32.mrb[27].mxu1  ;;  %v2216_v50 = vadd.f32 1e-05, %v2208_v56  ;;  %v2180_v5 = vadd.f32 %v2179_v53, %v2122_v55  ;;  %v4977_v51 = vmax.f32 %v3986_v58, 0.0 }
 0x204   :  { %v4979_v8 = vmax.f32 %v3987_v60, 0.0  ;;  %4571 = vrsqrt.f32 %v2215_v1  ;;  %v3989_v10 = vadd.f32 %v2010_v39, %v4916_v49  ;;  %v4995_v53 = vld [vmem:[#allocation6 + $0x1] ss:$8 sm:$0xf] }
 0x205   :  { %v4981_v9 = vmax.f32 %v3988_v47, 0.0  ;;  %4573 = vrsqrt.f32 %v2216_v50  ;;  %v2084_v12 = vadd.f32 %v2083_v40, %v4977_v51  ;;  %v2125_v13 = vmul.f32 %v4977_v51, %v4977_v51 }
 0x206   :  { %v2097_v15 = vadd.f32 %v2096_v0, %v4979_v8  ;;  %v2126_v17 = vmul.f32 %v4979_v8, %v4979_v8  ;;  %v4992_v20 = vmax.f32 %v3989_v10, 0.0  ;;  %v2231_v50 = vrot.slane %v4995_v53, %v4782_v28 }
 0x207   :  { %v2129_v42 = vmul.f32 %v4981_v9, %v4981_v9  ;;  %v2168_v43 = vadd.f32 %v2167_v38, %v2125_v13  ;;  %v2085_v25 = vadd.f32 %v2084_v12, %v4981_v9  ;;  %v2227_v38 = vrot.slane %v4995_v53, %v4777_v26 }
 0x208   :  { %v2014_v54 = vpop.f32.mrb[28].mxu1  ;;  %v2181_v33 = vadd.f32 %v2180_v5, %v2126_v17  ;;  %v2098_v34 = vadd.f32 %v2097_v15, %v4992_v20  ;;  %v2130_v40 = vmul.f32 %v4992_v20, %v4992_v20 }
 0x209   :  { %v3990_v41 = vadd.f32 %v2014_v54, %v4909_v35  ;;  %v2016_v0 = vpop.f32.mrb[29].mxu1  ;;  %v2169_v44 = vadd.f32 %v2168_v43, %v2129_v42 }
 0x20a   :  { %v3991_v56 = vadd.f32 %v2016_v0, %v4916_v49  ;;  %v2018_v55 = vpop.f32.mrb[30].mxu1  ;;  %v2182_v58 = vadd.f32 %v2181_v33, %v2130_v40 }
 0x20b   :  { %v5002_v60 = vmax.f32 %v3990_v41, 0.0  ;;  %v3992_v63 = vadd.f32 %v2018_v55, %v4909_v35  ;;  %v2020_v1 = vpop.f32.mrb[31].mxu1 }
 0x20c   :  { %v5007_v47 = vmax.f32 %v3991_v56, 0.0  ;;  %v3993_v39 = vadd.f32 %v2020_v1, %v4916_v49 }
 0x20d   :  { %v2086_v5 = vadd.f32 %v2085_v25, %v5002_v60  ;;  %v2133_v10 = vmul.f32 %v5002_v60, %v5002_v60  ;;  %v5015_v12 = vmax.f32 %v3992_v63, 0.0 }
 0x20e   :  { %v2099_v35 = vadd.f32 %v2098_v34, %v5007_v47  ;;  %v2134_v13 = vmul.f32 %v5007_v47, %v5007_v47  ;;  %v5020_v15 = vmax.f32 %v3993_v39, 0.0  ;;  %v4572_v17 = vpop.eup %4571 }
 0x20f   :  { %v2170_v42 = vadd.f32 %v2169_v44, %v2133_v10  ;;  %v2087_v49 = vadd.f32 %v2086_v5, %v5015_v12  ;;  %v2137_v43 = vmul.f32 %v5015_v12, %v5015_v12  ;;  %v4574_v25 = vpop.eup %4573  ;;  %v2244_v54 = vmul.f32 %v4572_v17, %v2227_v38 }
 0x210   :  { %v2183_v33 = vadd.f32 %v2182_v58, %v2134_v13  ;;  %v2100_v40 = vadd.f32 %v2099_v35, %v5020_v15  ;;  %v2138_v34 = vmul.f32 %v5020_v15, %v5020_v15  ;;  %v2245_v41 = vmul.f32 %v4574_v25, %v2231_v50 }
 0x211   :  { %v2088_v0 = vrot.slane %v2087_v49, 4  ;;  %v2171_v56 = vadd.f32 %v2170_v42, %v2137_v43  ;;  %v5029_v55 = vmul.f32 %v2244_v54, %v4944_v48  ;;  %v2285_v44 = vrot.slane %v2244_v54, %v4777_v26 }
 0x212   :  { %v2101_v63 = vrot.slane %v2100_v40, 4  ;;  %v2184_v1 = vadd.f32 %v2183_v33, %v2138_v34  ;;  %v5033_v39 = vmul.f32 %v2245_v41, %v4949_v6  ;;  %v2289_v58 = vrot.slane %v2245_v41, %v4777_v26 }
 0x213   :  { %v2089_v38 = vadd.f32 %v2088_v0, %v2087_v49  ;;  %v2172_v5 = vrot.slane %v2171_v56, 4  ;;  %v5037_v10 = vmul.f32 %v2285_v44, %v4897_v31  ;;  %v5040_v13 = vmul.f32 %v2285_v44, %v4798_v57 }
 0x214   :  { %v2102_v50 = vadd.f32 %v2101_v63, %v2100_v40  ;;  %v2185_v35 = vrot.slane %v2184_v1, 4  ;;  %v5045_v17 = vmul.f32 %v2289_v58, %v4902_v32  ;;  %v5048_v49 = vmul.f32 %v2289_v58, %v4801_v59 }
 0x215   :  { %v2090_v6 = vrot.slane %v2089_v38, 2  ;;  %v2173_v42 = vadd.f32 %v2172_v5, %v2171_v56  ;;  %v5051_v31 = vmul.f32 %v2289_v58, %v4806_v62  ;;  %v5054_v57 = vmul.f32 %v2285_v44, %v4804_v61 }
 0x216   :  { %v2103_v43 = vrot.slane %v2102_v50, 2  ;;  %v2186_v25 = vadd.f32 %v2185_v35, %v2184_v1  ;;  %v5057_v32 = vmul.f32 %v2289_v58, %v4829_v16  ;;  %v5060_v41 = vmul.f32 %v2289_v58, %v4840_v21 }
 0x217   :  { %v2091_v54 = vadd.f32 %v2090_v6, %v2089_v38  ;;  %v2174_v33 = vrot.slane %v2173_v42, 2  ;;  %v5063_v59 = vmul.f32 %v2285_v44, %v4826_v14  ;;  %v5066_v62 = vmul.f32 %v2285_v44, %v4835_v19 }
 0x218   :  { %v2104_v40 = vadd.f32 %v2103_v43, %v2102_v50  ;;  %v2187_v34 = vrot.slane %v2186_v25, 2  ;;  %v5069_v61 = vmul.f32 %v2289_v58, %v4857_v37  ;;  %v5072_v38 = vmul.f32 %v2289_v58, %v4868_v3 }
 0x219   :  { %v2092_v0 = vrot.slane %v2091_v54, 1  ;;  %v2175_v56 = vadd.f32 %v2174_v33, %v2173_v42  ;;  %v5075_v21 = vmul.f32 %v2285_v44, %v4854_v36  ;;  %v5078_v50 = vmul.f32 %v2285_v44, %v4863_v2 }
 0x21a   :  { %v2105_v63 = vrot.slane %v2104_v40, 1  ;;  %v2188_v1 = vadd.f32 %v2187_v34, %v2186_v25  ;;  %v5081_v19 = vmul.f32 %v2289_v58, %v4888_v46  ;;  %v5084_v6 = vmul.f32 %v2285_v44, %v4882_v22 }
 0x21b   :  { %v2093_v16 = vadd.f32 %v2092_v0, %v2091_v54  ;;  %v2176_v5 = vrot.slane %v2175_v56, 1  ;;  %v4669_v46 = vmov 1966171168   ;;  %v2235_v22 = vrot.slane %v4995_v53, %v4886_v24 }
 0x21c   :  { %v2106_v14 = vadd.f32 %v2105_v63, %v2104_v40  ;;  %v2189_v35 = vrot.slane %v2188_v1, 1  ;;  %v2259_v58 = vunpack.c.l.s4 %v4669_v46 }
 0x21d   :  { %v2177_v37 = vadd.f32 %v2176_v5, %v2175_v56  ;;  %v2193_v42 = vmul.f32 0.015625, %v2093_v16  ;;  %v2239_v56 = vrot.slane %v4995_v53, %v4892_v52 }
 0x21e   :  { %v2190_v3 = vadd.f32 %v2189_v35, %v2188_v1  ;;  %v2194_v43 = vmul.f32 0.015625, %v2106_v14  ;;  %v2260_v44 = vunpack.c.0.s8 %v2259_v58 }
 0x21f   :  { %v2197_v25 = vmul.f32 0.015625, %v2177_v37  ;;  %v2201_v54 = vmul.f32 %v2193_v42, %v2193_v42 }
 0x220   :  { %v2198_v33 = vmul.f32 0.015625, %v2190_v3  ;;  %v2202_v36 = vmul.f32 %v2194_v43, %v2194_v43  ;;  %v5091_v14 = vsub.s32 %v2260_v44, %v4774_v23  ;;  %v5395_v23 = vcombine.low %v5029_v55, %v5033_v39 }
 0x221   :  { %v2205_v34 = vsub.f32 %v2197_v25, %v2201_v54 }
 0x222   :  { %v2206_v0 = vsub.f32 %v2198_v33, %v2202_v36  ;;  %v2264_v36 = vrot.slane %v5395_v23, %v5091_v14 }
 0x223   :  { %v2209_v2 = vmax.f32 %v2205_v34, 0.0 }
 0x224   :  { %v2210_v48 = vmax.f32 %v2206_v0, 0.0 }
 0x225   :  { %v2217_v40 = vadd.f32 1e-05, %v2209_v2 }
 0x226   :  { %v2218_v63 = vadd.f32 1e-05, %v2210_v48 }
 0x227   :  { %4575 = vrsqrt.f32 %v2217_v40 }
 0x228   :  { %4577 = vrsqrt.f32 %v2218_v63 }
 0x231   :  { %v4576_v1 = vpop.eup %4575 }
 0x232   :  { %v4578_v16 = vpop.eup %4577  ;;  %v2246_v5 = vmul.f32 %v4576_v1, %v2235_v22 }
 0x233   :  { %v2247_v35 = vmul.f32 %v4578_v16, %v2239_v56 }
 0x234   :  { %v2250_v37 = vmul.f32 %v2246_v5, %v2193_v42  ;;  %v2293_v48 = vrot.slane %v2246_v5, %v4777_v26 }
 0x235   :  { %v2251_v3 = vmul.f32 %v2247_v35, %v2194_v43  ;;  %v2297_v25 = vrot.slane %v2247_v35, %v4777_v26  ;;  %v4504_v35 = vld [vmem:[#allocation4 + $0x844] ss:$16 sps:$4 sm:$0xff]  }
 0x236   :  { %v5096_v54 = vmul.f32 %v2293_v48, %v5015_v12  ;;  %v2304_v33 = vmul.f32 %v2293_v48, %v4928_v18  ;;  %v5100_v53 = vmul.f32 %v2293_v48, %v4946_v4  ;;  %v2312_v18 = vmul.f32 %v2293_v48, %v4964_v30 }
 0x237   :  { %v2257_v34 = vcombine.low %v2250_v37, %v2251_v3  ;;  %v5107_v42 = vmul.f32 %v2297_v25, %v5020_v15  ;;  %v2305_v43 = vmul.f32 %v2297_v25, %v4932_v45  ;;  %v2309_v0 = vmul.f32 %v2297_v25, %v4951_v27 }
 0x238   :  { %v2313_v12 = vmul.f32 %v2297_v25, %v4966_v29  ;;  %v2317_v4 = vmul.f32 %v2297_v25, %v4979_v8  ;;  %v2321_v40 = vmul.f32 %v2297_v25, %v4992_v20  ;;  %v2316_v55 = vmul.f32 %v2293_v48, %v4977_v51  ;;  %v2214_v29 = vld [vmem:[#allocation6 + $0x2] ss:$8 sm:$0xf] }
 0x239   :  { %v2271_v2 = vrot.slane %v2257_v34, %v5091_v14  ;;  %v2320_v39 = vmul.f32 %v2293_v48, %v4981_v9  ;;  %v5119_v15 = vmul.f32 %v2297_v25, %v5007_v47  ;;  %v5122_v45 = vmul.f32 %v2293_v48, %v5002_v60 }
 0x23a   :  { %v2301_v9 = vmul.f32 %v2297_v25, %v4923_v11  ;;  %v2300_v47 = vmul.f32 %v2293_v48, %v4920_v7  ;;  %v4499_v11 = vld [vmem:[#allocation4 + $0x820] ss:$16 sps:$4 sm:$0xff]  }
 0x23b   :  { %v2272_v27 = vcombine.low %v2264_v36, %v2271_v2  ;;  %v4502_v25 = vld [vmem:[#allocation4 + $0x840] ss:$16 sps:$4 sm:$0xff]  }
 0x23d   :  { %v2279_v30 = vrot.slane %v2272_v27, %v5091_v14 }
 0x23f   :  { %v2281_v63 = vsub.f32 %v2214_v29, %v2279_v30 }
 0x241   :  { %v2334_v8 = vrot.slane %v2281_v63, %v4777_v26  ;;  %v2338_v46 = vrot.slane %v2281_v63, %v4782_v28  ;;  %v2342_v20 = vrot.slane %v2281_v63, %v4886_v24  ;;  %v2346_v51 = vrot.slane %v2281_v63, %v4892_v52 }
 0x243   :  { %v2352_v60 = vadd.f32 %v2338_v46, %v5048_v49  ;;  %v2356_v58 = vadd.f32 %v2338_v46, %v5051_v31  ;;  %v2351_v22 = vadd.f32 %v2334_v8, %v5040_v13  ;;  %v2355_v44 = vadd.f32 %v2334_v8, %v5054_v57 }
 0x244   :  { %v2360_v56 = vadd.f32 %v2338_v46, %v5057_v32  ;;  %v2364_v1 = vadd.f32 %v2338_v46, %v5060_v41  ;;  %v2359_v24 = vadd.f32 %v2334_v8, %v5063_v59  ;;  %v2363_v52 = vadd.f32 %v2334_v8, %v5066_v62 }
 0x245   :  { %v2384_v16 = vpack.c.bf16 %v2356_v58, %v2352_v60  ;;  %v2383_v5 = vpack.c.bf16 %v2355_v44, %v2351_v22  ;;  %v2368_v7 = vadd.f32 %v2338_v46, %v5069_v61  ;;  %v2372_v49 = vadd.f32 %v2338_v46, %v5072_v38  ;;  %v4522_v60 = vld [vmem:[#allocation4 + $0x904] ss:$16 sps:$4 sm:$0xff]   ;;  %v4520_v58 = vld [vmem:[#allocation4 + $0x900] ss:$16 sps:$4 sm:$0xff]  }
 0x246   :  { %v2388_v31 = vpack.c.bf16 %v2364_v1, %v2360_v56  ;;  %v2387_v13 = vpack.c.bf16 %v2363_v52, %v2359_v24  ;;  %v2367_v57 = vadd.f32 %v2334_v8, %v5075_v21  ;;  %v2371_v32 = vadd.f32 %v2334_v8, %v5078_v50  ;;  %v4525_v22 = vld [vmem:[#allocation4 + $0x924] ss:$16 sps:$4 sm:$0xff]   ;;  %v4523_v44 = vld [vmem:[#allocation4 + $0x920] ss:$16 sps:$4 sm:$0xff]  }
 0x247   :  { %2828 = vmatprep.mubr.bf16.mxu0 %v2384_v16  ;;  %v2392_v41 = vpack.c.bf16 %v2372_v49, %v2368_v7  ;;  %v2376_v59 = vadd.f32 %v2338_v46, %v5081_v19  ;;  %v2380_v62 = vadd.f32 %v2338_v46, %v5045_v17  ;;  %v2375_v37 = vadd.f32 %v2334_v8, %v5084_v6  ;;  %v4507_v19 = vld [vmem:[#allocation4 + $0x864] ss:$16 sps:$4 sm:$0xff]   ;;  %v4526_v1 = vld [vmem:[#allocation4 + $0x940] ss:$16 sps:$4 sm:$0xff]  }
 0x248   :  { %2829 = vmatmul.mubr.bf16.vlgmr.msra.gmra.mrb[16].mxu0 %v2383_v5  ;;  %v2391_v48 = vpack.c.bf16 %v2371_v32, %v2367_v57  ;;  %v2379_v61 = vadd.f32 %v2334_v8, %v5037_v10  ;;  %v2354_v38 = vadd.f32 %v2346_v51, %v2301_v9  ;;  %v2358_v3 = vadd.f32 %v2346_v51, %v2305_v43  ;;  %v4513_v46 = vld [vmem:[#allocation4 + $0x8a4] ss:$16 sps:$4 sm:$0xff]   ;;  %v4529_v52 = vld [vmem:[#allocation4 + $0x960] ss:$16 sps:$4 sm:$0xff]  }
 0x249   :  { %2870 = vmatpush1.bf16.msra.mxu0 %v4499_v11  ;;  %2838 = vmatprep.mubr.bf16.mxu0 %v2388_v31  ;;  %v2396_v21 = vpack.c.bf16 %v2380_v62, %v2376_v59  ;;  %v5147_v23 = vadd.f32 %v2342_v20, %v2300_v47  ;;  %v5149_v50 = vadd.f32 %v2342_v20, %v2304_v33  ;;  %v4516_v9 = vld [vmem:[#allocation4 + $0x8c4] ss:$16 sps:$4 sm:$0xff]   ;;  %v4517_v47 = vld [vmem:[#allocation4 + $0x8e0] ss:$16 sps:$4 sm:$0xff]   ;;  %v4548_v59 = vld [vmem:[#allocation4 + $0x628] ss:$16 sps:$4 sm:$0xff]  }
 0x24a   :  { %2871 = vmatprep.subr.bf16.mxu0 %v4504_v35  ;;  %v2395_v36 = vpack.c.bf16 %v2379_v61, %v2375_v37  ;;  %v2386_v17 = vpack.c.bf16 %v2358_v3, %v2354_v38  ;;  %v5151_v34 = vadd.f32 %v2346_v51, %v2309_v0  ;;  %v5153_v6 = vadd.f32 %v2346_v51, %v2313_v12  ;;  %v4505_v12 = vld [vmem:[#allocation4 + $0x860] ss:$16 sps:$4 sm:$0xff]   ;;  %v4528_v56 = vld [vmem:[#allocation4 + $0x944] ss:$16 sps:$4 sm:$0xff]   ;;  %v4549_v62 = vld [vmem:[#allocation4 + $0x748] ss:$16 sps:$4 sm:$0xff]  }
 0x24b   :  { %v2385_v10 = vpack.c.bf16 %v5149_v50, %v5147_v23  ;;  %v5158_v43 = vadd.f32 %v2342_v20, %v5100_v53  ;;  %v5160_v2 = vadd.f32 %v2342_v20, %v2312_v18  ;;  %v5162_v27 = vadd.f32 %v2346_v51, %v2317_v4  ;;  %v4531_v24 = vld [vmem:[#allocation4 + $0x964] ss:$16 sps:$4 sm:$0xff]   ;;  %v4532_v11 = vld [vmem:[#allocation4 + $0x980] ss:$16 sps:$4 sm:$0xff]   ;;  %v4550_v37 = vld [vmem:[#allocation4 + $0x648] ss:$16 sps:$4 sm:$0xff]  }
 0x24c   :  { %v2390_v33 = vpack.c.bf16 %v5153_v6, %v5151_v34  ;;  %v5166_v29 = vadd.f32 %v2346_v51, %v2321_v40  ;;  %v5168_v30 = vadd.f32 %v2342_v20, %v2316_v55  ;;  %v5170_v0 = vadd.f32 %v2342_v20, %v2320_v39  ;;  %v4510_v40 = vld [vmem:[#allocation4 + $0x884] ss:$16 sps:$4 sm:$0xff]   ;;  %v4535_v7 = vld [vmem:[#allocation4 + $0x9a0] ss:$16 sps:$4 sm:$0xff]   ;;  %v4552_v61 = vld [vmem:[#allocation4 + $0x668] ss:$16 sps:$4 sm:$0xff]  }
 0x24d   :  { %2872 = vmatpush1.bf16.msra.mxu0 %v4502_v25  ;;  %v2389_v63 = vpack.c.bf16 %v5160_v2, %v5158_v43  ;;  %v5175_v53 = vadd.f32 %v2346_v51, %v5119_v15  ;;  %v5178_v18 = vadd.f32 %v2346_v51, %v5107_v42  ;;  %v5181_v4 = vadd.f32 %v2342_v20, %v5122_v45  ;;  %v4508_v45 = vld [vmem:[#allocation4 + $0x880] ss:$16 sps:$4 sm:$0xff]   ;;  %v4534_v16 = vld [vmem:[#allocation4 + $0x984] ss:$16 sps:$4 sm:$0xff]   ;;  %v4553_v38 = vld [vmem:[#allocation4 + $0x788] ss:$16 sps:$4 sm:$0xff]  }
 0x24e   :  { %2873 = vmatprep.subr.bf16.mxu0 %v4507_v19  ;;  %v2394_v55 = vpack.c.bf16 %v5166_v29, %v5162_v27  ;;  %v2393_v39 = vpack.c.bf16 %v5170_v0, %v5168_v30  ;;  %v5188_v8 = vadd.f32 %v2342_v20, %v5096_v54  ;;  %v4511_v51 = vld [vmem:[#allocation4 + $0x8a0] ss:$16 sps:$4 sm:$0xff]   ;;  %v4519_v20 = vld [vmem:[#allocation4 + $0x8e4] ss:$16 sps:$4 sm:$0xff]   ;;  %v4554_v3 = vld [vmem:[#allocation4 + $0x688] ss:$16 sps:$4 sm:$0xff]  }
 0x24f   :  { %v2398_v15 = vpack.c.bf16 %v5178_v18, %v5175_v53  ;;  %v4514_v54 = vld [vmem:[#allocation4 + $0x8c0] ss:$16 sps:$4 sm:$0xff]   ;;  %v4537_v5 = vld [vmem:[#allocation4 + $0x9a4] ss:$16 sps:$4 sm:$0xff]   ;;  %v4555_v25 = vld [vmem:[#allocation4 + $0x7a8] ss:$16 sps:$4 sm:$0xff]  }
 0x250   :  { %2839 = vmatmul.mubr.bf16.gmra.mrb[20].mxu0 %v2387_v13  ;;  %v2397_v42 = vpack.c.bf16 %v5188_v8, %v5181_v4  ;;  %v4540_v49 = vld [vmem:[#allocation4 + $0x9c4] ss:$16 sps:$4 sm:$0xff]   ;;  %v4538_v31 = vld [vmem:[#allocation4 + $0x9c0] ss:$16 sps:$4 sm:$0xff]   ;;  %v4557_v23 = vld [vmem:[#allocation4 + $0x7c8] ss:$16 sps:$4 sm:$0xff]  }
 0x251   :  { %2874 = vmatpush1.bf16.msra.mxu0 %v4505_v12  ;;  %2848 = vmatprep.mubr.bf16.mxu0 %v2392_v41  ;;  %v4543_v35 = vld [vmem:[#allocation4 + $0x9e4] ss:$16 sps:$4 sm:$0xff]   ;;  %v4541_v13 = vld [vmem:[#allocation4 + $0x9e0] ss:$16 sps:$4 sm:$0xff]   ;;  %v4547_v41 = vld [vmem:[#allocation4 + $0x728] ss:$16 sps:$4 sm:$0xff]  }
 0x252   :  { %2875 = vmatprep.subr.bf16.mxu0 %v4510_v40  ;;  %v4546_v57 = vld [vmem:[#allocation4 + $0xa04] ss:$16 sps:$4 sm:$0xff]   ;;  %v4544_v32 = vld [vmem:[#allocation4 + $0xa00] ss:$16 sps:$4 sm:$0xff]   ;;  %3870 = vmatprep.subr.bf16.mxu1 %v4547_v41  ;;  %v4558_v50 = vld [vmem:[#allocation4 + $0x6c8] ss:$16 sps:$4 sm:$0xff]  }
 0x253   :  { %3871 = vmatpush3.bf16.msra.mxu1 %v4548_v59  ;;  %v4559_v19 = vld [vmem:[#allocation4 + $0x7e8] ss:$16 sps:$4 sm:$0xff]  }
 0x254   :  { %3872 = vmatprep.subr.bf16.mxu1 %v4549_v62  ;;  %v4562_v34 = vld [vmem:[#allocation4 + $0x708] ss:$16 sps:$4 sm:$0xff]  }
 0x255   :  { %2876 = vmatpush1.bf16.msra.mxu0 %v4508_v45  ;;  %v2464_v6 = vld [vmem:[#allocation6 + $0x3] ss:$8 sm:$0x3] }
 0x256   :  { %2877 = vmatprep.subr.bf16.mxu0 %v4513_v46  ;;  %v5219_v43 = vrot.slane %v2464_v6, %v4782_v28 }
 0x257   :  { %3873 = vmatpush3.bf16.msra.mxu1 %v4550_v37 }
 0x258   :  { %2849 = vmatmul.mubr.bf16.gmra.mrb[24].mxu0 %v2391_v48  ;;  %v4551_v48 = vld [vmem:[#allocation4 + $0x768] ss:$16 sps:$4 sm:$0xff]  }
 0x259   :  { %2878 = vmatpush1.bf16.msra.mxu0 %v4511_v51  ;;  %2858 = vmatprep.mubr.bf16.mxu0 %v2396_v21  ;;  %v4556_v21 = vld [vmem:[#allocation4 + $0x6a8] ss:$16 sps:$4 sm:$0xff]  }
 0x25a   :  { %2879 = vmatprep.subr.bf16.mxu0 %v4516_v9  ;;  %3874 = vmatprep.subr.bf16.mxu1 %v4551_v48 }
 0x25b   :  { %3875 = vmatpush3.bf16.msra.mxu1 %v4552_v61 }
 0x25c   :  { %3876 = vmatprep.subr.bf16.mxu1 %v4553_v38 }
 0x25d   :  { %2880 = vmatpush1.bf16.msra.mxu0 %v4514_v54 }
 0x25e   :  { %2881 = vmatprep.subr.bf16.mxu0 %v4519_v20 }
 0x25f   :  { %3877 = vmatpush3.bf16.msra.mxu1 %v4554_v3 }
 0x260   :  { %2859 = vmatmul.mubr.bf16.gmra.mrb[28].mxu0 %v2395_v36  ;;  %3878 = vmatprep.subr.bf16.mxu1 %v4555_v25  ;;  %v4560_v36 = vld [vmem:[#allocation4 + $0x6e8] ss:$16 sps:$4 sm:$0xff]  }
 0x261   :  { %2882 = vmatpush1.bf16.msra.mxu0 %v4517_v47  ;;  %2901 = vmatprep.mubr.bf16.mxu0 %v2386_v17  ;;  %v4561_v17 = vld [vmem:[#allocation4 + $0x808] ss:$16 sps:$4 sm:$0xff]  }
 0x262   :  { %2883 = vmatprep.subr.bf16.mxu0 %v4522_v60 }
 0x263   :  { %3879 = vmatpush3.bf16.msra.mxu1 %v4556_v21 }
 0x264   :  { %3880 = vmatprep.subr.bf16.mxu1 %v4557_v23 }
 0x265   :  { %2884 = vmatpush1.bf16.msra.mxu0 %v4520_v58 }
 0x266   :  { %2885 = vmatprep.subr.bf16.mxu0 %v4525_v22 }
 0x267   :  { %3881 = vmatpush3.bf16.msra.mxu1 %v4558_v50 }
 0x268   :  { %3882 = vmatprep.subr.bf16.mxu1 %v4559_v19 }
 0x269   :  { %2886 = vmatpush1.bf16.msra.mxu0 %v4523_v44 }
 0x26a   :  { %2887 = vmatprep.subr.bf16.mxu0 %v4528_v56 }
 0x26b   :  { %3883 = vmatpush3.bf16.msra.mxu1 %v4560_v36 }
 0x26c   :  { %3884 = vmatprep.subr.bf16.mxu1 %v4561_v17 }
 0x26d   :  { %2888 = vmatpush1.bf16.msra.mxu0 %v4526_v1 }
 0x26e   :  { %2889 = vmatprep.subr.bf16.mxu0 %v4531_v24 }
 0x26f   :  { %3885 = vmatpush3.bf16.msra.mxu1 %v4562_v34 }
 0x271   :  { %2890 = vmatpush1.bf16.msra.mxu0 %v4529_v52 }
 0x272   :  { %2891 = vmatprep.subr.bf16.mxu0 %v4534_v16 }
 0x275   :  { %2892 = vmatpush1.bf16.msra.mxu0 %v4532_v11 }
 0x276   :  { %2893 = vmatprep.subr.bf16.mxu0 %v4537_v5 }
 0x279   :  { %2894 = vmatpush1.bf16.msra.mxu0 %v4535_v7 }
 0x27a   :  { %2895 = vmatprep.subr.bf16.mxu0 %v4540_v49 }
 0x27d   :  { %2896 = vmatpush1.bf16.msra.mxu0 %v4538_v31 }
 0x27e   :  { %2897 = vmatprep.subr.bf16.mxu0 %v4543_v35 }
 0x281   :  { %2898 = vmatpush1.bf16.msra.mxu0 %v4541_v13 }
 0x282   :  { %2899 = vmatprep.subr.bf16.mxu0 %v4546_v57 }
 0x285   :  { %2900 = vmatpush1.bf16.msra.mxu0 %v4544_v32 }
 0x288   :  { %2902 = vmatmul.mubr.bf16.vlgmr.msra.gmra.mrb[16].mxu0 %v2385_v10  ;;  %v5216_v10 = vrot.slane %v2464_v6, %v4777_v26 }
 0x289   :  { %2911 = vmatprep.mubr.bf16.mxu0 %v2390_v33 }
 0x290   :  { %2912 = vmatmul.mubr.bf16.gmra.mrb[20].mxu0 %v2389_v63 }
 0x291   :  { %2921 = vmatprep.mubr.bf16.mxu0 %v2394_v55 }
 0x298   :  { %2922 = vmatmul.mubr.bf16.gmra.mrb[24].mxu0 %v2393_v39 }
 0x299   :  { %2931 = vmatprep.mubr.bf16.mxu0 %v2398_v15 }
 0x2a0   :  { %2932 = vmatmul.mubr.bf16.gmra.mrb[28].mxu0 %v2397_v42 }
 0x35b   :  { %v2903_v2 = vpop.f32.mrb[16].mxu0 }
 0x35c   :  { %v3994_v27 = vadd.f32 %v2903_v2, %v5216_v10  ;;  %v2905_v33 = vpop.f32.mrb[17].mxu0 }
 0x35d   :  { %v3995_v29 = vadd.f32 %v2905_v33, %v5219_v43  ;;  %v2907_v30 = vpop.f32.mrb[18].mxu0 }
 0x35e   :  { %v5223_v0 = vmax.f32 %v3994_v27, 0.0  ;;  %v3996_v12 = vadd.f32 %v2907_v30, %v5216_v10  ;;  %v2909_v63 = vpop.f32.mrb[19].mxu0 }
 0x35f   :  { %v5226_v53 = vmax.f32 %v3995_v29, 0.0  ;;  %v3997_v18 = vadd.f32 %v2909_v63, %v5219_v43 }
 0x360   :  { %v5229_v4 = vmax.f32 %v3996_v12, 0.0  ;;  %v2984_v55 = vmul.f32 %v5223_v0, %v5223_v0 }
 0x361   :  { %v5231_v40 = vmax.f32 %v3997_v18, 0.0  ;;  %v2985_v15 = vmul.f32 %v5226_v53, %v5226_v53 }
 0x362   :  { %v2958_v39 = vadd.f32 %v5229_v4, %v5223_v0  ;;  %v2986_v8 = vmul.f32 %v5229_v4, %v5229_v4 }
 0x363   :  { %v2971_v42 = vadd.f32 %v5231_v40, %v5226_v53  ;;  %v2987_v45 = vmul.f32 %v5231_v40, %v5231_v40  ;;  %v2913_v46 = vpop.f32.mrb[20].mxu0 }
 0x364   :  { %v3000_v51 = vadd.f32 %v2986_v8, %v2984_v55  ;;  %v3998_v9 = vadd.f32 %v2913_v46, %v5216_v10  ;;  %v2915_v54 = vpop.f32.mrb[21].mxu0 }
 0x365   :  { %v3013_v20 = vadd.f32 %v2987_v45, %v2985_v15  ;;  %v3999_v47 = vadd.f32 %v2915_v54, %v5219_v43  ;;  %v2917_v60 = vpop.f32.mrb[22].mxu0 }
 0x366   :  { %v5247_v58 = vmax.f32 %v3998_v9, 0.0  ;;  %v4000_v22 = vadd.f32 %v2917_v60, %v5216_v10  ;;  %v2919_v44 = vpop.f32.mrb[23].mxu0 }
 0x367   :  { %v5250_v56 = vmax.f32 %v3999_v47, 0.0  ;;  %v4001_v1 = vadd.f32 %v2919_v44, %v5219_v43 }
 0x368   :  { %v2959_v24 = vadd.f32 %v2958_v39, %v5247_v58  ;;  %v2988_v52 = vmul.f32 %v5247_v58, %v5247_v58  ;;  %v5256_v16 = vmax.f32 %v4000_v22, 0.0 }
 0x369   :  { %v2972_v11 = vadd.f32 %v2971_v42, %v5250_v56  ;;  %v2989_v5 = vmul.f32 %v5250_v56, %v5250_v56  ;;  %v5261_v7 = vmax.f32 %v4001_v1, 0.0 }
 0x36a   :  { %v3001_v49 = vadd.f32 %v3000_v51, %v2988_v52  ;;  %v2960_v31 = vadd.f32 %v2959_v24, %v5256_v16  ;;  %v2990_v35 = vmul.f32 %v5256_v16, %v5256_v16 }
 0x36b   :  { %v3014_v13 = vadd.f32 %v3013_v20, %v2989_v5  ;;  %v2973_v57 = vadd.f32 %v2972_v11, %v5261_v7  ;;  %v2991_v32 = vmul.f32 %v5261_v7, %v5261_v7  ;;  %v2923_v41 = vpop.f32.mrb[24].mxu0 }
 0x36c   :  { %v3002_v59 = vadd.f32 %v3001_v49, %v2990_v35  ;;  %v4002_v62 = vadd.f32 %v2923_v41, %v5216_v10  ;;  %v2925_v37 = vpop.f32.mrb[25].mxu0 }
 0x36d   :  { %v3015_v48 = vadd.f32 %v3014_v13, %v2991_v32  ;;  %v4003_v61 = vadd.f32 %v2925_v37, %v5219_v43  ;;  %v2927_v38 = vpop.f32.mrb[26].mxu0 }
 0x36e   :  { %v5271_v3 = vmax.f32 %v4002_v62, 0.0  ;;  %v4004_v25 = vadd.f32 %v2927_v38, %v5216_v10  ;;  %v2929_v21 = vpop.f32.mrb[27].mxu0 }
 0x36f   :  { %v5274_v23 = vmax.f32 %v4003_v61, 0.0  ;;  %v4005_v50 = vadd.f32 %v2929_v21, %v5219_v43 }
 0x370   :  { %v2961_v19 = vadd.f32 %v2960_v31, %v5271_v3  ;;  %v2992_v36 = vmul.f32 %v5271_v3, %v5271_v3  ;;  %v5280_v17 = vmax.f32 %v4004_v25, 0.0 }
 0x371   :  { %v2974_v34 = vadd.f32 %v2973_v57, %v5274_v23  ;;  %v2993_v6 = vmul.f32 %v5274_v23, %v5274_v23  ;;  %v5285_v2 = vmax.f32 %v4005_v50, 0.0 }
 0x372   :  { %v3003_v27 = vadd.f32 %v3002_v59, %v2992_v36  ;;  %v2962_v33 = vadd.f32 %v2961_v19, %v5280_v17  ;;  %v2994_v29 = vmul.f32 %v5280_v17, %v5280_v17 }
 0x373   :  { %v3016_v30 = vadd.f32 %v3015_v48, %v2993_v6  ;;  %v2975_v12 = vadd.f32 %v2974_v34, %v5285_v2  ;;  %v2995_v63 = vmul.f32 %v5285_v2, %v5285_v2  ;;  %v2933_v18 = vpop.f32.mrb[28].mxu0 }
 0x374   :  { %v3004_v55 = vadd.f32 %v3003_v27, %v2994_v29  ;;  %v4006_v39 = vadd.f32 %v2933_v18, %v5216_v10  ;;  %v2935_v8 = vpop.f32.mrb[29].mxu0 }
 0x375   :  { %v3017_v15 = vadd.f32 %v3016_v30, %v2995_v63  ;;  %v4007_v42 = vadd.f32 %v2935_v8, %v5219_v43  ;;  %v2937_v45 = vpop.f32.mrb[30].mxu0 }
 0x376   :  { %v5295_v46 = vmax.f32 %v4006_v39, 0.0  ;;  %v4008_v51 = vadd.f32 %v2937_v45, %v5216_v10  ;;  %v2939_v9 = vpop.f32.mrb[31].mxu0 }
 0x377   :  { %v5298_v54 = vmax.f32 %v4007_v42, 0.0  ;;  %v4009_v20 = vadd.f32 %v2939_v9, %v5219_v43 }
 0x378   :  { %v2963_v47 = vadd.f32 %v2962_v33, %v5295_v46  ;;  %v2996_v60 = vmul.f32 %v5295_v46, %v5295_v46  ;;  %v2956_v22 = vmax.f32 %v4008_v51, 0.0 }
 0x379   :  { %v2976_v44 = vadd.f32 %v2975_v12, %v5298_v54  ;;  %v2997_v1 = vmul.f32 %v5298_v54, %v5298_v54  ;;  %v5307_v24 = vmax.f32 %v4009_v20, 0.0 }
 0x37a   :  { %v3005_v52 = vadd.f32 %v3004_v55, %v2996_v60  ;;  %v2964_v10 = vadd.f32 %v2963_v47, %v2956_v22  ;;  %v2998_v11 = vmul.f32 %v2956_v22, %v2956_v22 }
 0x37b   :  { %v3018_v5 = vadd.f32 %v3017_v15, %v2997_v1  ;;  %v2977_v49 = vadd.f32 %v2976_v44, %v5307_v24  ;;  %v2999_v43 = vmul.f32 %v5307_v24, %v5307_v24  ;;  %v3037_v1 = vld [vmem:[#allocation6 + $0x4] ss:$8 sm:$0x3] }
 0x37c   :  { %v2965_v31 = vrot.slane %v2964_v10, 4  ;;  %v3006_v35 = vadd.f32 %v3005_v52, %v2998_v11  ;;  %v3048_v52 = vrot.slane %v3037_v1, %v4777_v26 }
 0x37d   :  { %v2978_v13 = vrot.slane %v2977_v49, 4  ;;  %v3019_v57 = vadd.f32 %v3018_v5, %v2999_v43 }
 0x37e   :  { %v2966_v32 = vadd.f32 %v2965_v31, %v2964_v10  ;;  %v3007_v41 = vrot.slane %v3006_v35, 4  ;;  %v3052_v10 = vrot.slane %v3037_v1, %v4782_v28  ;;  %v4569_v1 = vld [vmem:[#allocation4 + $0x6ec] ss:$16 sps:$4 sm:$0xff]  }
 0x37f   :  { %v2979_v59 = vadd.f32 %v2978_v13, %v2977_v49  ;;  %v3020_v62 = vrot.slane %v3019_v57, 4 }
 0x380   :  { %v2967_v37 = vrot.slane %v2966_v32, 2  ;;  %v3008_v48 = vadd.f32 %v3007_v41, %v3006_v35 }
 0x381   :  { %v2980_v61 = vrot.slane %v2979_v59, 2  ;;  %v3021_v38 = vadd.f32 %v3020_v62, %v3019_v57 }
 0x382   :  { %v2968_v25 = vadd.f32 %v2967_v37, %v2966_v32  ;;  %v3009_v21 = vrot.slane %v3008_v48, 2 }
 0x383   :  { %v2981_v50 = vadd.f32 %v2980_v61, %v2979_v59  ;;  %v3022_v19 = vrot.slane %v3021_v38, 2 }
 0x384   :  { %v2969_v36 = vrot.slane %v2968_v25, 1  ;;  %v3010_v34 = vadd.f32 %v3009_v21, %v3008_v48 }
 0x385   :  { %v2982_v6 = vrot.slane %v2981_v50, 1  ;;  %v3023_v27 = vadd.f32 %v3022_v19, %v3021_v38  ;;  %v3039_v19 = vld [vmem:[#allocation6 + $0x5] ss:$8 sm:$0x3] }
 0x386   :  { %v2970_v33 = vadd.f32 %v2969_v36, %v2968_v25  ;;  %v3011_v29 = vrot.slane %v3010_v34, 1 }
 0x387   :  { %v2983_v30 = vadd.f32 %v2982_v6, %v2981_v50  ;;  %v3024_v12 = vrot.slane %v3023_v27, 1 }
 0x388   :  { %v3012_v63 = vadd.f32 %v3011_v29, %v3010_v34  ;;  %v3026_v18 = vmul.f32 0.015625, %v2970_v33 }
 0x389   :  { %v3025_v55 = vadd.f32 %v3024_v12, %v3023_v27  ;;  %v3027_v39 = vmul.f32 0.015625, %v2983_v30 }
 0x38a   :  { %v3028_v8 = vmul.f32 0.015625, %v3012_v63  ;;  %v3030_v15 = vmul.f32 %v3026_v18, %v3026_v18 }
 0x38b   :  { %v3029_v42 = vmul.f32 0.015625, %v3025_v55  ;;  %v3031_v45 = vmul.f32 %v3027_v39, %v3027_v39 }
 0x38c   :  { %v3032_v51 = vsub.f32 %v3028_v8, %v3030_v15 }
 0x38d   :  { %v3033_v9 = vsub.f32 %v3029_v42, %v3031_v45 }
 0x38e   :  { %v3034_v20 = vmax.f32 %v3032_v51, 0.0  ;;  %v4563_v51 = vld [vmem:[#allocation4 + $0x62c] ss:$16 sps:$4 sm:$0xff]  }
 0x38f   :  { %v3035_v47 = vmax.f32 %v3033_v9, 0.0  ;;  %3922 = vmatprep.subr.bf16.mxu1 %v4563_v51  ;;  %v4564_v9 = vld [vmem:[#allocation4 + $0x64c] ss:$16 sps:$4 sm:$0xff]  }
 0x390   :  { %v3040_v60 = vadd.f32 1e-05, %v3034_v20  ;;  %v4565_v20 = vld [vmem:[#allocation4 + $0x66c] ss:$16 sps:$4 sm:$0xff]  }
 0x391   :  { %v3041_v44 = vadd.f32 1e-05, %v3035_v47  ;;  %v4566_v47 = vld [vmem:[#allocation4 + $0x68c] ss:$16 sps:$4 sm:$0xff]  }
 0x392   :  { %4579 = vrsqrt.f32 %v3040_v60  ;;  %v4567_v60 = vld [vmem:[#allocation4 + $0x6ac] ss:$16 sps:$4 sm:$0xff]  }
 0x393   :  { %4581 = vrsqrt.f32 %v3041_v44  ;;  %v4568_v44 = vld [vmem:[#allocation4 + $0x6cc] ss:$16 sps:$4 sm:$0xff]  }
 0x39c   :  { %v4580_v11 = vpop.eup %4579 }
 0x39d   :  { %v4582_v5 = vpop.eup %4581  ;;  %v3055_v49 = vmul.f32 %v4580_v11, %v3048_v52  ;;  %v4570_v52 = vld [vmem:[#allocation4 + $0x70c] ss:$16 sps:$4 sm:$0xff]   ;;  %v3169_v11 = vld [vmem:[#allocation6 + $0x6] ss:$0 sm:$0xff] }
 0x39e   :  { %v3056_v43 = vmul.f32 %v4582_v5, %v3052_v10 }
 0x39f   :  { %v3057_v31 = vmul.f32 %v3055_v49, %v3026_v18  ;;  %v3081_v35 = vrot.slane %v3055_v49, %v4777_v26 }
 0x3a0   :  { %v3058_v13 = vmul.f32 %v3056_v43, %v3027_v39  ;;  %v3085_v57 = vrot.slane %v3056_v43, %v4777_v26 }
 0x3a1   :  { %v3100_v32 = vmul.f32 %v3081_v35, %v2956_v22  ;;  %v3086_v41 = vmul.f32 %v3081_v35, %v5223_v0  ;;  %v3088_v59 = vmul.f32 %v3081_v35, %v5229_v4  ;;  %v3090_v62 = vmul.f32 %v3081_v35, %v5247_v58 }
 0x3a2   :  { %v3061_v37 = vcombine.low %v3057_v31, %v3058_v13  ;;  %v3101_v48 = vmul.f32 %v3085_v57, %v5307_v24  ;;  %v3087_v61 = vmul.f32 %v3085_v57, %v5226_v53  ;;  %v3089_v38 = vmul.f32 %v3085_v57, %v5231_v40 }
 0x3a3   :  { %v3091_v25 = vmul.f32 %v3085_v57, %v5250_v56  ;;  %v3093_v21 = vmul.f32 %v3085_v57, %v5261_v7  ;;  %v3092_v50 = vmul.f32 %v3081_v35, %v5256_v16  ;;  %v3095_v22 = vmul.f32 %v3085_v57, %v5274_v23 }
 0x3a4   :  { %v3068_v0 = vrot.slane %v3061_v37, %v5091_v14  ;;  %v3097_v4 = vmul.f32 %v3085_v57, %v5285_v2  ;;  %v3094_v58 = vmul.f32 %v3081_v35, %v5271_v3  ;;  %v3096_v24 = vmul.f32 %v3081_v35, %v5280_v17 }
 0x3a5   :  { %v3099_v53 = vmul.f32 %v3085_v57, %v5298_v54  ;;  %v3098_v40 = vmul.f32 %v3081_v35, %v5295_v46 }
 0x3a6   :  { %v3075_v56 = vrot.slane %v3068_v0, %v5091_v14 }
 0x3a8   :  { %v3077_v7 = vsub.f32 %v3039_v19, %v3075_v56 }
 0x3aa   :  { %v3106_v16 = vrot.slane %v3077_v7, %v4777_v26  ;;  %v3110_v23 = vrot.slane %v3077_v7, %v4782_v28 }
 0x3ac   :  { %v3114_v36 = vadd.f32 %v3110_v23, %v3087_v61  ;;  %v3116_v34 = vadd.f32 %v3110_v23, %v3089_v38  ;;  %v3113_v6 = vadd.f32 %v3106_v16, %v3086_v41  ;;  %v3115_v2 = vadd.f32 %v3106_v16, %v3088_v59 }
 0x3ad   :  { %v3118_v27 = vadd.f32 %v3110_v23, %v3091_v25  ;;  %v3120_v3 = vadd.f32 %v3110_v23, %v3093_v21  ;;  %v3117_v33 = vadd.f32 %v3106_v16, %v3090_v62  ;;  %v3119_v17 = vadd.f32 %v3106_v16, %v3092_v50 }
 0x3ae   :  { %v3130_v29 = vpack.c.bf16 %v3116_v34, %v3114_v36  ;;  %v3129_v30 = vpack.c.bf16 %v3115_v2, %v3113_v6  ;;  %v3122_v54 = vadd.f32 %v3110_v23, %v3095_v22  ;;  %v3124_v12 = vadd.f32 %v3110_v23, %v3097_v4 }
 0x3af   :  { %v3132_v46 = vpack.c.bf16 %v3120_v3, %v3118_v27  ;;  %v3131_v63 = vpack.c.bf16 %v3119_v17, %v3117_v33  ;;  %v3121_v14 = vadd.f32 %v3106_v16, %v3094_v58  ;;  %v3123_v18 = vadd.f32 %v3106_v16, %v3096_v24 }
 0x3b0   :  { %3298 = vmatprep.mubr.bf16.mxu1 %v3130_v29  ;;  %v3134_v26 = vpack.c.bf16 %v3124_v12, %v3122_v54  ;;  %v3126_v55 = vadd.f32 %v3110_v23, %v3099_v53  ;;  %v3128_v28 = vadd.f32 %v3110_v23, %v3101_v48  ;;  %v3125_v39 = vadd.f32 %v3106_v16, %v3098_v40 }
 0x3b1   :  { %3299 = vmatmul.mubr.bf16.vlgmr.msra.gmra.mrb[32].mxu1 %v3129_v30  ;;  %v3133_v8 = vpack.c.bf16 %v3123_v18, %v3121_v14  ;;  %v3127_v15 = vadd.f32 %v3106_v16, %v3100_v32 }
 0x3b2   :  { %3306 = vmatprep.mubr.bf16.mxu1 %v3132_v46  ;;  %v3136_v42 = vpack.c.bf16 %v3128_v28, %v3126_v55  ;;  %3923 = vmatpush3.bf16.msra.mxu1 %v4563_v51 }
 0x3b3   :  { %v3135_v45 = vpack.c.bf16 %v3127_v15, %v3125_v39  ;;  %3924 = vmatprep.subr.bf16.mxu1 %v4564_v9 }
 0x3b6   :  { %3925 = vmatpush3.bf16.msra.mxu1 %v4564_v9 }
 0x3b7   :  { %3926 = vmatprep.subr.bf16.mxu1 %v4565_v20 }
 0x3b9   :  { %3307 = vmatmul.mubr.bf16.gmra.mrb[36].mxu1 %v3131_v63 }
 0x3ba   :  { %3314 = vmatprep.mubr.bf16.mxu1 %v3134_v26  ;;  %3927 = vmatpush3.bf16.msra.mxu1 %v4565_v20 }
 0x3bb   :  { %3928 = vmatprep.subr.bf16.mxu1 %v4566_v47 }
 0x3be   :  { %3929 = vmatpush3.bf16.msra.mxu1 %v4566_v47 }
 0x3bf   :  { %3930 = vmatprep.subr.bf16.mxu1 %v4567_v60 }
 0x3c1   :  { %3315 = vmatmul.mubr.bf16.gmra.mrb[40].mxu1 %v3133_v8 }
 0x3c2   :  { %3322 = vmatprep.mubr.bf16.mxu1 %v3136_v42  ;;  %3931 = vmatpush3.bf16.msra.mxu1 %v4567_v60 }
 0x3c3   :  { %3932 = vmatprep.subr.bf16.mxu1 %v4568_v44 }
 0x3c6   :  { %3933 = vmatpush3.bf16.msra.mxu1 %v4568_v44 }
 0x3c7   :  { %3934 = vmatprep.subr.bf16.mxu1 %v4569_v1 }
 0x3c9   :  { %3323 = vmatmul.mubr.bf16.gmra.mrb[44].mxu1 %v3135_v45 }
 0x3ca   :  { %3935 = vmatpush3.bf16.msra.mxu1 %v4569_v1 }
 0x3cb   :  { %3936 = vmatprep.subr.bf16.mxu1 %v4570_v52 }
 0x3ce   :  { %3937 = vmatpush3.bf16.msra.mxu1 %v4570_v52 }
 0x484   :  { %v3886_v10 = vpop.f32.mrb[32].mxu1 }
 0x485   :  { %v3887_v5 = vpop.f32.mrb[33].mxu1 }
 0x486   :  { %v3888_v49 = vadd.f32 %v3887_v5, %v3886_v10  ;;  %v3889_v43 = vpop.f32.mrb[34].mxu1 }
 0x487   :  { %v3890_v31 = vpop.f32.mrb[35].mxu1 }
 0x488   :  { %v3301_v35 = vadd.f32 %v3888_v49, %v3169_v11  ;;  %v3891_v13 = vadd.f32 %v3890_v31, %v3889_v43 }
 0x48a   :  { %v5335_v57 = vmax.f32 %v3301_v35, 0.0  ;;  %v3304_v32 = vadd.f32 %v3891_v13, %v3169_v11 }
 0x48c   :  { %v5337_v41 = vmax.f32 %v3304_v32, 0.0  ;;  %v3892_v59 = vpop.f32.mrb[36].mxu1  ;;  %v3352_v37 = vmul.f32 %v5335_v57, %v5335_v57 }
 0x48d   :  { %v3893_v62 = vpop.f32.mrb[37].mxu1 }
 0x48e   :  { %v3339_v48 = vadd.f32 %v5337_v41, %v5335_v57  ;;  %v3353_v61 = vmul.f32 %v5337_v41, %v5337_v41  ;;  %v3894_v38 = vadd.f32 %v3893_v62, %v3892_v59  ;;  %v3895_v25 = vpop.f32.mrb[38].mxu1 }
 0x48f   :  { %v3896_v21 = vpop.f32.mrb[39].mxu1 }
 0x490   :  { %v3360_v50 = vadd.f32 %v3353_v61, %v3352_v37  ;;  %v3309_v22 = vadd.f32 %v3894_v38, %v3169_v11  ;;  %v3897_v0 = vadd.f32 %v3896_v21, %v3895_v25 }
 0x492   :  { %v5345_v4 = vmax.f32 %v3309_v22, 0.0  ;;  %v3312_v58 = vadd.f32 %v3897_v0, %v3169_v11 }
 0x494   :  { %v3340_v24 = vadd.f32 %v3339_v48, %v5345_v4  ;;  %v3354_v19 = vmul.f32 %v5345_v4, %v5345_v4  ;;  %v5350_v53 = vmax.f32 %v3312_v58, 0.0  ;;  %v3898_v40 = vpop.f32.mrb[40].mxu1  ;;  %v3379_v58 = vld [vmem:[#allocation6 + $0x20] ss:$0 sm:$0xff] }
 0x495   :  { %v3899_v56 = vpop.f32.mrb[41].mxu1 }
 0x496   :  { %v3361_v7 = vadd.f32 %v3360_v50, %v3354_v19  ;;  %v3341_v16 = vadd.f32 %v3340_v24, %v5350_v53  ;;  %v3355_v23 = vmul.f32 %v5350_v53, %v5350_v53  ;;  %v3900_v36 = vadd.f32 %v3899_v56, %v3898_v40  ;;  %v3901_v34 = vpop.f32.mrb[42].mxu1  ;;  %v3378_v50 = vld [vmem:[#allocation6 + $0x7] ss:$0 sm:$0xff] }
 0x497   :  { %v3902_v6 = vpop.f32.mrb[43].mxu1 }
 0x498   :  { %v3362_v2 = vadd.f32 %v3361_v7, %v3355_v23  ;;  %v3317_v27 = vadd.f32 %v3900_v36, %v3169_v11  ;;  %v3903_v3 = vadd.f32 %v3902_v6, %v3901_v34 }
 0x49a   :  { %v3335_v33 = vmax.f32 %v3317_v27, 0.0  ;;  %v3320_v17 = vadd.f32 %v3903_v3, %v3169_v11 }
 0x49c   :  { %v3342_v29 = vadd.f32 %v3341_v16, %v3335_v33  ;;  %v3356_v30 = vmul.f32 %v3335_v33, %v3335_v33  ;;  %v3336_v54 = vmax.f32 %v3320_v17, 0.0  ;;  %v3904_v12 = vpop.f32.mrb[44].mxu1 }
 0x49d   :  { %v3905_v46 = vpop.f32.mrb[45].mxu1 }
 0x49e   :  { %v3363_v63 = vadd.f32 %v3362_v2, %v3356_v30  ;;  %v3343_v14 = vadd.f32 %v3342_v29, %v3336_v54  ;;  %v3357_v18 = vmul.f32 %v3336_v54, %v3336_v54  ;;  %v3906_v26 = vadd.f32 %v3905_v46, %v3904_v12  ;;  %v3907_v55 = vpop.f32.mrb[46].mxu1 }
 0x49f   :  { %v3908_v28 = vpop.f32.mrb[47].mxu1 }
 0x4a0   :  { %v3364_v39 = vadd.f32 %v3363_v63, %v3357_v18  ;;  %v3325_v8 = vadd.f32 %v3906_v26, %v3169_v11  ;;  %v3909_v15 = vadd.f32 %v3908_v28, %v3907_v55 }
 0x4a2   :  { %v3337_v42 = vmax.f32 %v3325_v8, 0.0  ;;  %v3328_v45 = vadd.f32 %v3909_v15, %v3169_v11 }
 0x4a4   :  { %v3344_v51 = vadd.f32 %v3343_v14, %v3337_v42  ;;  %v3358_v9 = vmul.f32 %v3337_v42, %v3337_v42  ;;  %v3338_v20 = vmax.f32 %v3328_v45, 0.0 }
 0x4a6   :  { %v3365_v47 = vadd.f32 %v3364_v39, %v3358_v9  ;;  %v3345_v60 = vadd.f32 %v3344_v51, %v3338_v20  ;;  %v3359_v44 = vmul.f32 %v3338_v20, %v3338_v20 }
 0x4a8   :  { %v3346_v1 = vrot.slane %v3345_v60, 4  ;;  %v3366_v52 = vadd.f32 %v3365_v47, %v3359_v44 }
 0x4aa   :  { %v3347_v10 = vadd.f32 %v3346_v1, %v3345_v60  ;;  %v3367_v5 = vrot.slane %v3366_v52, 4 }
 0x4ac   :  { %v3348_v49 = vrot.slane %v3347_v10, 2  ;;  %v3368_v43 = vadd.f32 %v3367_v5, %v3366_v52 }
 0x4ae   :  { %v3349_v31 = vadd.f32 %v3348_v49, %v3347_v10  ;;  %v3369_v35 = vrot.slane %v3368_v43, 2 }
 0x4b0   :  { %v3350_v13 = vrot.slane %v3349_v31, 1  ;;  %v3370_v32 = vadd.f32 %v3369_v35, %v3368_v43 }
 0x4b2   :  { %v3351_v59 = vadd.f32 %v3350_v13, %v3349_v31  ;;  %v3371_v62 = vrot.slane %v3370_v32, 1 }
 0x4b4   :  { %v3372_v37 = vadd.f32 %v3371_v62, %v3370_v32  ;;  %v3373_v11 = vmul.f32 0.015625, %v3351_v59 }
 0x4b6   :  { %v3374_v48 = vmul.f32 0.015625, %v3372_v37  ;;  %v3375_v61 = vmul.f32 %v3373_v11, %v3373_v11 }
 0x4b8   :  { %v3376_v38 = vsub.f32 %v3374_v48, %v3375_v61 }
 0x4ba   :  { %v3377_v25 = vmax.f32 %v3376_v38, 0.0 }
 0x4bc   :  { %v3380_v21 = vadd.f32 1e-05, %v3377_v25 }
 0x4be   :  { %4583 = vrsqrt.f32 %v3380_v21 }
 0x4c8   :  { %v4584_v22 = vpop.eup %4583 }
 0x4c9   :  { %v3382_v0 = vmul.f32 %v4584_v22, %v3378_v50 }
 0x4cb   :  { %v3383_v24 = vmul.f32 %v3382_v0, %v3373_v11  ;;  %v3392_v19 = vmul.f32 %v3382_v0, %v3338_v20  ;;  %v3385_v40 = vmul.f32 %v3382_v0, %v5335_v57  ;;  %v3386_v56 = vmul.f32 %v3382_v0, %v5337_v41 }
 0x4cc   :  { %v3387_v7 = vmul.f32 %v3382_v0, %v5345_v4  ;;  %v3388_v16 = vmul.f32 %v3382_v0, %v5350_v53  ;;  %v3389_v23 = vmul.f32 %v3382_v0, %v3335_v33  ;;  %v3390_v36 = vmul.f32 %v3382_v0, %v3336_v54  ;;  %v3421_v4 = vld [vmem:[#allocation6 + $0x21] ss:$0 sm:$0xff] }
 0x4cd   :  { %v3384_v34 = vsub.f32 %v3379_v58, %v3383_v24  ;;  %v3391_v6 = vmul.f32 %v3382_v0, %v3337_v42 }
 0x4cf   :  { %v3393_v2 = vadd.f32 %v3385_v40, %v3384_v34  ;;  %v3394_v27 = vadd.f32 %v3386_v56, %v3384_v34  ;;  %v3395_v3 = vadd.f32 %v3387_v7, %v3384_v34  ;;  %v3396_v17 = vadd.f32 %v3388_v16, %v3384_v34 }
 0x4d0   :  { %v3397_v29 = vadd.f32 %v3389_v23, %v3384_v34  ;;  %v3398_v30 = vadd.f32 %v3390_v36, %v3384_v34  ;;  %v3399_v12 = vadd.f32 %v3391_v6, %v3384_v34  ;;  %v3400_v46 = vadd.f32 %v3392_v19, %v3384_v34 }
 0x4d1   :  { %v3401_v63 = vpack.c.bf16 %v3394_v27, %v3393_v2  ;;  %v3402_v57 = vpack.c.bf16 %v3396_v17, %v3395_v3 }
 0x4d2   :  { %v3403_v14 = vpack.c.bf16 %v3398_v30, %v3397_v29  ;;  %v3404_v41 = vpack.c.bf16 %v3400_v46, %v3399_v12 }
 0x4d3   :  { %3938 = vmatprep.mubr.bf16.mxu1 %v3401_v63 }
 0x4d4   :  { %3939 = vmatmul.mubr.bf16.vlgmr.msra.gmra.mrb[48].mxu1 %v3402_v57 }
 0x4d5   :  { %3942 = vmatprep.mubr.bf16.mxu1 %v3403_v14 }
 0x4dc   :  { %3943 = vmatmul.mubr.bf16.gmra.mrb[52].mxu1 %v3404_v41 }
 0x5a7   :  { %v3940_v53 = vpop.f32.mrb[48].mxu1 }
 0x5a8   :  { %v3513_v33 = vadd.f32 %v3940_v53, %v3421_v4  ;;  %v3504_v54 = vpop.f32.mrb[49].mxu1 }
 0x5a9   :  { %v3505_v18 = vadd.f32 %v3504_v54, %v3421_v4  ;;  %v3941_v26 = vpop.f32.mrb[50].mxu1 }
 0x5aa   :  { %3538 = vst.msk [vmem:[%s5394_s3 + $0x10] sm:$0xff] %vm3535_vm1, %v3513_v33  ;;  %v3516_v55 = vadd.f32 %v3941_v26, %v3421_v4  ;;  %v3507_v28 = vpop.f32.mrb[51].mxu1 }
 0x5ab   :  { %3536 = vst.msk [vmem:[%s5394_s3] sm:$0xff] %vm3535_vm1, %v3505_v18  ;;  %v3508_v39 = vadd.f32 %v3507_v28, %v3421_v4 }
 0x5ac   :  { %3539 = vst.msk [vmem:[%s5394_s3 + $0x18] sm:$0xff] %vm3535_vm1, %v3516_v55 }
 0x5ad   :  { %3537 = vst.msk [vmem:[%s5394_s3 + $0x8] sm:$0xff] %vm3535_vm1, %v3508_v39 }
 0x5af   :  { %v3944_v8 = vpop.f32.mrb[52].mxu1 }
 0x5b0   :  { %v3529_v15 = vadd.f32 %v3944_v8, %v3421_v4  ;;  %v3520_v42 = vpop.f32.mrb[53].mxu1 }
 0x5b1   :  { %v3521_v45 = vadd.f32 %v3520_v42, %v3421_v4  ;;  %v3945_v51 = vpop.f32.mrb[54].mxu1 }
 0x5b2   :  { %3542 = vst.msk [vmem:[%s5394_s3 + $0x30] sm:$0xff] %vm3535_vm1, %v3529_v15  ;;  %v3532_v9 = vadd.f32 %v3945_v51, %v3421_v4  ;;  %v3523_v20 = vpop.f32.mrb[55].mxu1 }
 0x5b3   :  { %3540 = vst.msk [vmem:[%s5394_s3 + $0x20] sm:$0xff] %vm3535_vm1, %v3521_v45  ;;  %v3524_v47 = vadd.f32 %v3523_v20, %v3421_v4 }
 0x5b4   :  { %3543 = vst.msk [vmem:[%s5394_s3 + $0x38] sm:$0xff] %vm3535_vm1, %v3532_v9 }
 0x5b5   :  { %3541 = vst.msk [vmem:[%s5394_s3 + $0x28] sm:$0xff] %vm3535_vm1, %v3524_v47 }
 0x5b6   :  { %3548 = vsyncpa [#allocation3], 1 }
 0x5b7   :  { %3549 = vsyncpa [#allocation5], 1 }

</bundles_post_ra>
